<compile_context>
chip_gen: v7x
topology: tpu7x:2x2x1
jax: 0.10.0
libtpu: 0.0.40
codegen_flags: <defaults>
</compile_context>

<pallas_src>
import functools

import jax
import jax.numpy as jnp
from jax.experimental import pallas as pl
from jax.experimental.pallas import tpu as pltpu


_ARB = pltpu.CompilerParams(dimension_semantics=("arbitrary",))


# --------------------------------------------------------------------------- #
# Fused GNN stack: node encoder + L x GENConv + running JumpingKnowledge(max)
# --------------------------------------------------------------------------- #
def _gnn_stack_kernel(xr_ref, ew_ref, eb_ref, adj_ref, t_ref, s_ref,
                      w1_ref, b1_ref, w2_ref, b2_ref,
                      o_ref, h_sc, jk_sc):
    l = pl.program_id(0)
    eps = jnp.float32(1e-7)

    @pl.when(l == 0)
    def _():
        # node encoder fused into layer-0 init: h = x_raw @ W_enc + b_enc
        h_sc[...] = (jnp.dot(xr_ref[...], ew_ref[...],
                             preferred_element_type=jnp.float32) + eb_ref[...])
        jk_sc[...] = jnp.full_like(jk_sc, -jnp.inf)

    x = h_sc[...]                        # [N, H] current node features
    adj = adj_ref[...]                   # [N, N], adj[i, j] = 1 if edge j -> i
    t = t_ref[l]                         # softmax temperature (SMEM scalar)
    s = s_ref[l]                         # MessageNorm scale   (SMEM scalar)

    # GENConv message + softmax aggregation in matmul form (no 3-D broadcast):
    #   m_j = relu(x_j) + eps, weights = softmax_j(t * m_j) over in-neighbors.
    # Softmax is shift-invariant, so a per-feature global max replaces the
    # per-target masked max (exact; exp stays <= 1, m >= eps keeps it safe).
    m = jnp.maximum(x, 0.0) + eps                                   # [N, H]
    logit = t * m
    mx = jnp.max(logit, axis=0, keepdims=True)                      # [1, H]
    p = jnp.exp(logit - mx)                                         # [N, H]
    num = jnp.dot(adj, p * m, preferred_element_type=jnp.float32)   # [N, H] MXU
    den = jnp.dot(adj, p, preferred_element_type=jnp.float32)       # [N, H] MXU
    aggr = num / jnp.maximum(den, eps)

    # MessageNorm (learnable scale s) + residual
    a_nrm = jnp.sqrt(jnp.sum(aggr * aggr, axis=-1, keepdims=True))
    x_nrm = jnp.sqrt(jnp.sum(x * x, axis=-1, keepdims=True))
    y = x + aggr / jnp.maximum(a_nrm, jnp.float32(1e-12)) * x_nrm * s

    # GENConv 2-layer MLP (expansion 2) + outer per-layer ReLU
    # TODO(synk): PyG GENConv's MLP has a BatchNorm between the linears; at
    # deterministic eval-mode init it is the identity, so it is omitted.
    hid = jnp.maximum(
        jnp.dot(y, w1_ref[...], preferred_element_type=jnp.float32) + b1_ref[...],
        0.0)
    h_new = jnp.maximum(
        jnp.dot(hid, w2_ref[...], preferred_element_type=jnp.float32) + b2_ref[...],
        0.0)

    h_sc[...] = h_new
    jk_sc[...] = jnp.maximum(jk_sc[...], h_new)      # running JK('max')

    @pl.when(l == pl.num_programs(0) - 1)
    def _():
        o_ref[...] = jk_sc[...]


def gnn_stack(x_raw, adj, p):
    n, fin = x_raw.shape
    hidden = p["enc_w"].shape[1]
    num_layers = p["t"].shape[0]
    return pl.pallas_call(
        _gnn_stack_kernel,
        out_shape=jax.ShapeDtypeStruct((n, hidden), jnp.float32),
        grid=(num_layers,),
        in_specs=[
            pl.BlockSpec((n, fin), lambda l: (0, 0)),                 # x_raw
            pl.BlockSpec((fin, hidden), lambda l: (0, 0)),            # enc_w
            pl.BlockSpec((1, hidden), lambda l: (0, 0)),              # enc_b
            pl.BlockSpec((n, n), lambda l: (0, 0)),                   # adj
            pl.BlockSpec(memory_space=pltpu.MemorySpace.SMEM),        # t [L]
            pl.BlockSpec(memory_space=pltpu.MemorySpace.SMEM),        # s [L]
            pl.BlockSpec((None, hidden, 2 * hidden), lambda l: (l, 0, 0)),  # w1
            pl.BlockSpec((None, 1, 2 * hidden), lambda l: (l, 0, 0)),       # b1
            pl.BlockSpec((None, 2 * hidden, hidden), lambda l: (l, 0, 0)),  # w2
            pl.BlockSpec((None, 1, hidden), lambda l: (l, 0, 0)),           # b2
        ],
        out_specs=pl.BlockSpec((n, hidden), lambda l: (0, 0)),
        scratch_shapes=[pltpu.VMEM((n, hidden), jnp.float32),   # h (layer state)
                        pltpu.VMEM((n, hidden), jnp.float32)],  # JK max accumulator
        compiler_params=_ARB,
    )(x_raw, p["enc_w"], p["enc_b"], adj, p["t"], p["s"],
      p["w1"], p["b1"], p["w2"], p["b2"])


# --------------------------------------------------------------------------- #
# Fused Set2Set readout (LSTM + masked attention, process_step iterations)
# + final output Linear(2H, output_dim)
# --------------------------------------------------------------------------- #
def _set2set_out_kernel(x_ref, mask_ref, wq_ref, wr_ref, b_ref,
                        owq_ref, owr_ref, ob_ref, o_ref, *, steps):
    x = x_ref[...]                       # [N, H] node features (VMEM-resident)
    mask = mask_ref[...]                 # [B, N] per-graph membership mask
    bsz, hdim = mask.shape[0], x.shape[1]
    q = jnp.zeros((bsz, hdim), jnp.float32)    # LSTM hidden (first half of q*)
    c = jnp.zeros((bsz, hdim), jnp.float32)    # LSTM cell
    r = jnp.zeros((bsz, hdim), jnp.float32)    # attention readout (second half)

    for _ in range(steps):
        # LSTM gates; w_ih[:H] has been pre-folded with w_hh (both act on q).
        def gate(k):
            return (jnp.dot(q, wq_ref[k], preferred_element_type=jnp.float32)
                    + jnp.dot(r, wr_ref[k], preferred_element_type=jnp.float32)
                    + b_ref[k])
        i_g = jax.nn.sigmoid(gate(0))            # PyTorch gate order i, f, g, o
        f_g = jax.nn.sigmoid(gate(1))
        g_g = jnp.tanh(gate(2))
        o_g = jax.nn.sigmoid(gate(3))
        c = f_g * c + i_g * g_g
        q = o_g * jnp.tanh(c)

        # per-graph masked softmax attention over nodes + weighted sum (MXU)
        e = jax.lax.dot_general(q, x, (((1,), (1,)), ((), ())),
                                preferred_element_type=jnp.float32)   # [B, N]
        lg = jnp.where(mask > 0, e, jnp.float32(-1e30))
        mxv = jnp.max(lg, axis=1, keepdims=True)
        pw = jnp.exp(lg - mxv) * mask
        den = jnp.maximum(jnp.sum(pw, axis=1, keepdims=True), jnp.float32(1e-12))
        r = jnp.dot(pw / den, x, preferred_element_type=jnp.float32)  # [B, H]

    # final Linear(2H, output_dim) fused: out = [q, r] @ W_out + b_out
    o_ref[...] = (jnp.dot(q, owq_ref[...], preferred_element_type=jnp.float32)
                  + jnp.dot(r, owr_ref[...], preferred_element_type=jnp.float32)
                  + ob_ref[...])


def set2set_readout(x, graph_mask, p, steps):
    n, hdim = x.shape
    bsz = graph_mask.shape[0]
    out_dim = p["out_w"].shape[1]
    # Repack PyTorch-layout LSTM weights into per-gate stacks so the kernel
    # never slices or concatenates along the lane axis.
    wih4 = jnp.stack(jnp.split(p["w_ih"], 4, axis=1), axis=0)     # [4, 2H, H]
    whh4 = jnp.stack(jnp.split(p["w_hh"], 4, axis=1), axis=0)     # [4,  H, H]
    b4 = jnp.stack(
        jnp.split((p["b_ih"] + p["b_hh"]).reshape(1, -1), 4, axis=1), axis=0)  # [4,1,H]
    wq4 = wih4[:, :hdim, :] + whh4     # acts on q (LSTM hidden == first half of q*)
    wr4 = wih4[:, hdim:, :]            # acts on r
    owq = p["out_w"][:hdim, :]
    owr = p["out_w"][hdim:, :]
    ob = p["out_b"].reshape(1, out_dim)
    return pl.pallas_call(
        functools.partial(_set2set_out_kernel, steps=steps),
        out_shape=jax.ShapeDtypeStruct((bsz, out_dim), jnp.float32),
        grid=(1,),
        in_specs=[
            pl.BlockSpec((n, hdim), lambda i: (0, 0)),
            pl.BlockSpec((bsz, n), lambda i: (0, 0)),
            pl.BlockSpec((4, hdim, hdim), lambda i: (0, 0, 0)),
            pl.BlockSpec((4, hdim, hdim), lambda i: (0, 0, 0)),
            pl.BlockSpec((4, 1, hdim), lambda i: (0, 0, 0)),
            pl.BlockSpec((hdim, out_dim), lambda i: (0, 0)),
            pl.BlockSpec((hdim, out_dim), lambda i: (0, 0)),
            pl.BlockSpec((1, out_dim), lambda i: (0, 0)),
        ],
        out_specs=pl.BlockSpec((bsz, out_dim), lambda i: (0, 0)),
        compiler_params=_ARB,
    )(x, graph_mask, wq4, wr4, b4, owq, owr, ob)


# --------------------------------------------------------------------------- #
# Forward + parameter setup
# --------------------------------------------------------------------------- #
def extractor_forward(params, x, adj, graph_mask, process_step):
    h = gnn_stack(x, adj, params["gnn"])                         # [N, H]  (1 call)
    return set2set_readout(h, graph_mask, params["head"], process_step)  # [B, D]


def init_params(key, gnn_layers, input_dim, hidden_dim, output_dim):
    keys = iter(jax.random.split(key, 4 + 2 * gnn_layers))

    def lin_init(k, fan_in, fan_out):
        kw, kb = jax.random.split(k)
        lim = 1.0 / jnp.sqrt(jnp.float32(fan_in))
        w = jax.random.uniform(kw, (fan_in, fan_out), jnp.float32, -lim, lim)
        b = jax.random.uniform(kb, (fan_out,), jnp.float32, -lim, lim)
        return w, b

    enc_w, enc_b = lin_init(next(keys), input_dim, hidden_dim)
    w1s, b1s, w2s, b2s = [], [], [], []
    for _ in range(gnn_layers):
        w1, b1 = lin_init(next(keys), hidden_dim, 2 * hidden_dim)
        w2, b2 = lin_init(next(keys), 2 * hidden_dim, hidden_dim)
        w1s.append(w1); b1s.append(b1.reshape(1, -1))
        w2s.append(w2); b2s.append(b2.reshape(1, -1))
    w_ih, b_ih = lin_init(next(keys), 2 * hidden_dim, 4 * hidden_dim)
    w_hh, b_hh = lin_init(next(keys), hidden_dim, 4 * hidden_dim)
    out_w, out_b = lin_init(next(keys), 2 * hidden_dim, output_dim)

    gnn = dict(
        enc_w=enc_w, enc_b=enc_b.reshape(1, -1),
        t=jnp.ones((gnn_layers,), jnp.float32),   # learnable softmax temperature
        s=jnp.ones((gnn_layers,), jnp.float32),   # learnable MessageNorm scale
        w1=jnp.stack(w1s), b1=jnp.stack(b1s),
        w2=jnp.stack(w2s), b2=jnp.stack(b2s))
    head = dict(w_ih=w_ih, w_hh=w_hh, b_ih=b_ih, b_hh=b_hh,
                out_w=out_w, out_b=out_b)
    return dict(gnn=gnn, head=head)


# --------------------------------------------------------------------------- #
if __name__ == "__main__":
    GNN_LAYERS, INPUT_DIM, HIDDEN_DIM, OUTPUT_DIM = 2, 8, 32, 16
    PROCESS_STEP = 2
    B, N_PER_GRAPH = 2, 8
    N = B * N_PER_GRAPH

    key = jax.random.PRNGKey(0)
    kx, _ = jax.random.split(key)
    x = jax.random.normal(kx, (N, INPUT_DIM), jnp.float32)

    # Two small graphs, each a bidirectional ring of 8 nodes.
    src, dst = [], []
    for g in range(B):
        base = g * N_PER_GRAPH
        for i in range(N_PER_GRAPH):
            j = (i + 1) % N_PER_GRAPH
            src += [base + i, base + j]
            dst += [base + j, base + i]
    adj = jnp.zeros((N, N), jnp.float32).at[jnp.array(dst), jnp.array(src)].set(1.0)

    graph_mask = jnp.zeros((B, N), jnp.float32)
    for g in range(B):
        graph_mask = graph_mask.at[g, g * N_PER_GRAPH:(g + 1) * N_PER_GRAPH].set(1.0)

    params = init_params(jax.random.PRNGKey(42), GNN_LAYERS, INPUT_DIM,
                         HIDDEN_DIM, OUTPUT_DIM)

    fwd = jax.jit(functools.partial(extractor_forward, process_step=PROCESS_STEP))
    out = fwd(params, x, adj, graph_mask)
    jax.block_until_ready(out)
    assert out.shape == (B, OUTPUT_DIM) and out.dtype == jnp.float32
    print("KERNEL_OK")
</pallas_src>

<mosaic_0001>
module attributes {stable_mosaic.version = 11 : i64} {
  func.func @_gnn_stack_kernel(%arg0: i32, %arg1: memref<16x8xf32, #tpu.memory_space<vmem>>, %arg2: memref<8x32xf32, #tpu.memory_space<vmem>>, %arg3: memref<1x32xf32, #tpu.memory_space<vmem>>, %arg4: memref<16x16xf32, #tpu.memory_space<vmem>>, %arg5: memref<2xf32, #tpu.memory_space<smem>>, %arg6: memref<2xf32, #tpu.memory_space<smem>>, %arg7: memref<1x32x64xf32, #tpu.memory_space<vmem>>, %arg8: memref<1x1x64xf32, #tpu.memory_space<vmem>>, %arg9: memref<1x64x32xf32, #tpu.memory_space<vmem>>, %arg10: memref<1x1x32xf32, #tpu.memory_space<vmem>>, %arg11: memref<16x32xf32, #tpu.memory_space<vmem>>, %arg12: memref<16x32xf32, #tpu.memory_space<vmem>>, %arg13: memref<16x32xf32, #tpu.memory_space<vmem>>) attributes {dimension_semantics = [#tpu.dimension_semantics<arbitrary>], iteration_bounds = array<i64: 2>, scalar_prefetch = 0 : i64, scratch_operands = 2 : i64, tpu.core_type = #tpu.core_type<tc>, window_params = [{pipeline_mode = #tpu.pipeline_mode<synchronous>, transform_indices = @transform_0, window_bounds = array<i64: 16, 8>}, {pipeline_mode = #tpu.pipeline_mode<synchronous>, transform_indices = @transform_1, window_bounds = array<i64: 8, 32>}, {pipeline_mode = #tpu.pipeline_mode<synchronous>, transform_indices = @transform_2, window_bounds = array<i64: 1, 32>}, {pipeline_mode = #tpu.pipeline_mode<synchronous>, transform_indices = @transform_3, window_bounds = array<i64: 16, 16>}, {transform_indices = @transform_4, window_bounds = array<i64: 2>}, {transform_indices = @transform_5, window_bounds = array<i64: 2>}, {transform_indices = @transform_6, window_bounds = array<i64: 1, 32, 64>}, {transform_indices = @transform_7, window_bounds = array<i64: 1, 1, 64>}, {transform_indices = @transform_8, window_bounds = array<i64: 1, 64, 32>}, {transform_indices = @transform_9, window_bounds = array<i64: 1, 1, 32>}, {pipeline_mode = #tpu.pipeline_mode<synchronous>, transform_indices = @transform_10, window_bounds = array<i64: 16, 32>}]} {
    %c0_i32 = arith.constant 0 : i32
    %0 = arith.cmpi eq, %arg0, %c0_i32 : i32
    %1 = arith.extui %0 : i1 to i32
    %c0_i32_0 = arith.constant 0 : i32
    %2 = arith.cmpi ne, %1, %c0_i32_0 : i32
    scf.if %2 {
      %c0_35 = arith.constant 0 : index
      %c0_36 = arith.constant 0 : index
      %68 = vector.load %arg1[%c0_35, %c0_36] : memref<16x8xf32, #tpu.memory_space<vmem>>, vector<16x8xf32>
      %c0_37 = arith.constant 0 : index
      %c0_38 = arith.constant 0 : index
      %69 = vector.load %arg2[%c0_37, %c0_38] : memref<8x32xf32, #tpu.memory_space<vmem>>, vector<8x32xf32>
      %cst_39 = arith.constant dense<0.000000e+00> : vector<16x32xf32>
      %70 = tpu.matmul %68, %69, %cst_39 {dimension_numbers = #tpu.dot_dimension_numbers<[1], [0], [0], [1], [0, 0, 1, 1], [], []>} : vector<16x8xf32>, vector<8x32xf32>, vector<16x32xf32> -> vector<16x32xf32>
      %c0_40 = arith.constant 0 : index
      %c0_41 = arith.constant 0 : index
      %71 = vector.load %arg3[%c0_40, %c0_41] : memref<1x32xf32, #tpu.memory_space<vmem>>, vector<1x32xf32>
      %72 = vector.broadcast %71 : vector<1x32xf32> to vector<16x32xf32>
      %73 = arith.addf %70, %72 : vector<16x32xf32>
      %c0_42 = arith.constant 0 : index
      %c0_43 = arith.constant 0 : index
      %74 = vector.load %arg12[%c0_42, %c0_43] : memref<16x32xf32, #tpu.memory_space<vmem>>, vector<16x32xf32>
      tpu.vector_store %arg12[%c0_42, %c0_43], %73 {strides = array<i32>} : memref<16x32xf32, #tpu.memory_space<vmem>>, vector<16x32xf32>,
      %cst_44 = arith.constant 0xFF800000 : f32
      %75 = vector.broadcast %cst_44 : f32 to vector<16x32xf32>
      %c0_45 = arith.constant 0 : index
      %c0_46 = arith.constant 0 : index
      %76 = vector.load %arg13[%c0_45, %c0_46] : memref<16x32xf32, #tpu.memory_space<vmem>>, vector<16x32xf32>
      tpu.vector_store %arg13[%c0_45, %c0_46], %75 {strides = array<i32>} : memref<16x32xf32, #tpu.memory_space<vmem>>, vector<16x32xf32>,
    } else {
    }
    %c0 = arith.constant 0 : index
    %c0_1 = arith.constant 0 : index
    %3 = vector.load %arg12[%c0, %c0_1] : memref<16x32xf32, #tpu.memory_space<vmem>>, vector<16x32xf32>
    %c0_2 = arith.constant 0 : index
    %c0_3 = arith.constant 0 : index
    %4 = vector.load %arg4[%c0_2, %c0_3] : memref<16x16xf32, #tpu.memory_space<vmem>>, vector<16x16xf32>
    %5 = arith.index_cast %arg0 : i32 to index
    %6 = memref.load %arg5[%5] : memref<2xf32, #tpu.memory_space<smem>>
    %7 = arith.index_cast %arg0 : i32 to index
    %8 = memref.load %arg6[%7] : memref<2xf32, #tpu.memory_space<smem>>
    %cst = arith.constant 0.000000e+00 : f32
    %9 = vector.broadcast %cst : f32 to vector<16x32xf32>
    %10 = arith.maximumf %3, %9 : vector<16x32xf32>
    %cst_4 = arith.constant 1.000000e-07 : f32
    %11 = vector.broadcast %cst_4 : f32 to vector<16x32xf32>
    %12 = arith.addf %10, %11 : vector<16x32xf32>
    %13 = vector.broadcast %6 : f32 to vector<16x32xf32>
    %14 = arith.mulf %13, %12 : vector<16x32xf32>
    %cst_5 = arith.constant dense<0xFF800000> : vector<32xf32>
    %15 = vector.multi_reduction <maximumf>, %14, %cst_5 [0] : vector<16x32xf32> to vector<32xf32>
    %16 = vector.shape_cast %15 : vector<32xf32> to vector<1x32xf32>
    %17 = vector.broadcast %16 : vector<1x32xf32> to vector<16x32xf32>
    %18 = arith.subf %14, %17 : vector<16x32xf32>
    %19 = math.exp %18 : vector<16x32xf32>
    %20 = arith.mulf %19, %12 : vector<16x32xf32>
    %cst_6 = arith.constant dense<0.000000e+00> : vector<16x32xf32>
    %21 = tpu.matmul %4, %20, %cst_6 {dimension_numbers = #tpu.dot_dimension_numbers<[1], [0], [0], [1], [0, 0, 1, 1], [], []>} : vector<16x16xf32>, vector<16x32xf32>, vector<16x32xf32> -> vector<16x32xf32>
    %cst_7 = arith.constant dense<0.000000e+00> : vector<16x32xf32>
    %22 = tpu.matmul %4, %19, %cst_7 {dimension_numbers = #tpu.dot_dimension_numbers<[1], [0], [0], [1], [0, 0, 1, 1], [], []>} : vector<16x16xf32>, vector<16x32xf32>, vector<16x32xf32> -> vector<16x32xf32>
    %cst_8 = arith.constant 1.000000e-07 : f32
    %23 = vector.broadcast %cst_8 : f32 to vector<16x32xf32>
    %24 = arith.maximumf %22, %23 : vector<16x32xf32>
    %25 = arith.divf %21, %24 : vector<16x32xf32>
    %26 = arith.mulf %25, %25 : vector<16x32xf32>
    %cst_9 = arith.constant dense<0.000000e+00> : vector<16xf32>
    %27 = vector.multi_reduction <add>, %26, %cst_9 [1] : vector<16x32xf32> to vector<16xf32>
    %28 = vector.shape_cast %27 : vector<16xf32> to vector<16x1xf32>
    %29 = math.sqrt %28 : vector<16x1xf32>
    %30 = arith.mulf %3, %3 : vector<16x32xf32>
    %cst_10 = arith.constant dense<0.000000e+00> : vector<16xf32>
    %31 = vector.multi_reduction <add>, %30, %cst_10 [1] : vector<16x32xf32> to vector<16xf32>
    %32 = vector.shape_cast %31 : vector<16xf32> to vector<16x1xf32>
    %33 = math.sqrt %32 : vector<16x1xf32>
    %cst_11 = arith.constant 9.99999996E-13 : f32
    %34 = vector.broadcast %cst_11 : f32 to vector<16x1xf32>
    %35 = arith.maximumf %29, %34 : vector<16x1xf32>
    %36 = vector.broadcast %35 : vector<16x1xf32> to vector<16x32xf32>
    %37 = arith.divf %25, %36 : vector<16x32xf32>
    %38 = vector.broadcast %33 : vector<16x1xf32> to vector<16x32xf32>
    %39 = arith.mulf %37, %38 : vector<16x32xf32>
    %40 = vector.broadcast %8 : f32 to vector<16x32xf32>
    %41 = arith.mulf %39, %40 : vector<16x32xf32>
    %42 = arith.addf %3, %41 : vector<16x32xf32>
    %c0_12 = arith.constant 0 : index
    %c0_13 = arith.constant 0 : index
    %c0_14 = arith.constant 0 : index
    %43 = vector.load %arg7[%c0_12, %c0_13, %c0_14] : memref<1x32x64xf32, #tpu.memory_space<vmem>>, vector<1x32x64xf32>
    %44 = vector.shape_cast %43 : vector<1x32x64xf32> to vector<32x64xf32>
    %cst_15 = arith.constant dense<0.000000e+00> : vector<16x64xf32>
    %45 = tpu.matmul %42, %44, %cst_15 {dimension_numbers = #tpu.dot_dimension_numbers<[1], [0], [0], [1], [0, 0, 1, 1], [], []>} : vector<16x32xf32>, vector<32x64xf32>, vector<16x64xf32> -> vector<16x64xf32>
    %c0_16 = arith.constant 0 : index
    %c0_17 = arith.constant 0 : index
    %c0_18 = arith.constant 0 : index
    %46 = vector.load %arg8[%c0_16, %c0_17, %c0_18] : memref<1x1x64xf32, #tpu.memory_space<vmem>>, vector<1x1x64xf32>
    %47 = vector.shape_cast %46 : vector<1x1x64xf32> to vector<1x64xf32>
    %48 = vector.broadcast %47 : vector<1x64xf32> to vector<16x64xf32>
    %49 = arith.addf %45, %48 : vector<16x64xf32>
    %cst_19 = arith.constant 0.000000e+00 : f32
    %50 = vector.broadcast %cst_19 : f32 to vector<16x64xf32>
    %51 = arith.maximumf %49, %50 : vector<16x64xf32>
    %c0_20 = arith.constant 0 : index
    %c0_21 = arith.constant 0 : index
    %c0_22 = arith.constant 0 : index
    %52 = vector.load %arg9[%c0_20, %c0_21, %c0_22] : memref<1x64x32xf32, #tpu.memory_space<vmem>>, vector<1x64x32xf32>
    %53 = vector.shape_cast %52 : vector<1x64x32xf32> to vector<64x32xf32>
    %cst_23 = arith.constant dense<0.000000e+00> : vector<16x32xf32>
    %54 = tpu.matmul %51, %53, %cst_23 {dimension_numbers = #tpu.dot_dimension_numbers<[1], [0], [0], [1], [0, 0, 1, 1], [], []>} : vector<16x64xf32>, vector<64x32xf32>, vector<16x32xf32> -> vector<16x32xf32>
    %c0_24 = arith.constant 0 : index
    %c0_25 = arith.constant 0 : index
    %c0_26 = arith.constant 0 : index
    %55 = vector.load %arg10[%c0_24, %c0_25, %c0_26] : memref<1x1x32xf32, #tpu.memory_space<vmem>>, vector<1x1x32xf32>
    %56 = vector.shape_cast %55 : vector<1x1x32xf32> to vector<1x32xf32>
    %57 = vector.broadcast %56 : vector<1x32xf32> to vector<16x32xf32>
    %58 = arith.addf %54, %57 : vector<16x32xf32>
    %cst_27 = arith.constant 0.000000e+00 : f32
    %59 = vector.broadcast %cst_27 : f32 to vector<16x32xf32>
    %60 = arith.maximumf %58, %59 : vector<16x32xf32>
    %c0_28 = arith.constant 0 : index
    %c0_29 = arith.constant 0 : index
    %61 = vector.load %arg12[%c0_28, %c0_29] : memref<16x32xf32, #tpu.memory_space<vmem>>, vector<16x32xf32>
    tpu.vector_store %arg12[%c0_28, %c0_29], %60 {strides = array<i32>} : memref<16x32xf32, #tpu.memory_space<vmem>>, vector<16x32xf32>,
    %c0_30 = arith.constant 0 : index
    %c0_31 = arith.constant 0 : index
    %62 = vector.load %arg13[%c0_30, %c0_31] : memref<16x32xf32, #tpu.memory_space<vmem>>, vector<16x32xf32>
    %63 = arith.maximumf %62, %60 : vector<16x32xf32>
    %c0_32 = arith.constant 0 : index
    %c0_33 = arith.constant 0 : index
    %64 = vector.load %arg13[%c0_32, %c0_33] : memref<16x32xf32, #tpu.memory_space<vmem>>, vector<16x32xf32>
    tpu.vector_store %arg13[%c0_32, %c0_33], %63 {strides = array<i32>} : memref<16x32xf32, #tpu.memory_space<vmem>>, vector<16x32xf32>,
    %c1_i32 = arith.constant 1 : i32
    %65 = arith.cmpi eq, %arg0, %c1_i32 : i32
    %66 = arith.extui %65 : i1 to i32
    %c0_i32_34 = arith.constant 0 : i32
    %67 = arith.cmpi ne, %66, %c0_i32_34 : i32
    scf.if %67 {
      %c0_35 = arith.constant 0 : index
      %c0_36 = arith.constant 0 : index
      %68 = vector.load %arg13[%c0_35, %c0_36] : memref<16x32xf32, #tpu.memory_space<vmem>>, vector<16x32xf32>
      %c0_37 = arith.constant 0 : index
      %c0_38 = arith.constant 0 : index
      %69 = vector.load %arg11[%c0_37, %c0_38] : memref<16x32xf32, #tpu.memory_space<vmem>>, vector<16x32xf32>
      tpu.vector_store %arg11[%c0_37, %c0_38], %68 {strides = array<i32>} : memref<16x32xf32, #tpu.memory_space<vmem>>, vector<16x32xf32>,
    } else {
    }
    return
  }
  func.func @transform_0(%arg0: i32) -> (i32, i32) {
    %c0_i32 = arith.constant 0 : i32
    %c0_i32_0 = arith.constant 0 : i32
    %c0_i32_1 = arith.constant 0 : i32
    return %c0_i32, %c0_i32_0 : i32, i32
  }
  func.func @transform_1(%arg0: i32) -> (i32, i32) {
    %c0_i32 = arith.constant 0 : i32
    %c0_i32_0 = arith.constant 0 : i32
    %c0_i32_1 = arith.constant 0 : i32
    return %c0_i32, %c0_i32_0 : i32, i32
  }
  func.func @transform_2(%arg0: i32) -> (i32, i32) {
    %c0_i32 = arith.constant 0 : i32
    %c0_i32_0 = arith.constant 0 : i32
    %c0_i32_1 = arith.constant 0 : i32
    return %c0_i32, %c0_i32_0 : i32, i32
  }
  func.func @transform_3(%arg0: i32) -> (i32, i32) {
    %c0_i32 = arith.constant 0 : i32
    %c0_i32_0 = arith.constant 0 : i32
    %c0_i32_1 = arith.constant 0 : i32
    return %c0_i32, %c0_i32_0 : i32, i32
  }
  func.func @transform_4(%arg0: i32) -> i32 {
    %c0_i32 = arith.constant 0 : i32
    %c0_i32_0 = arith.constant 0 : i32
    return %c0_i32 : i32
  }
  func.func @transform_5(%arg0: i32) -> i32 {
    %c0_i32 = arith.constant 0 : i32
    %c0_i32_0 = arith.constant 0 : i32
    return %c0_i32 : i32
  }
  func.func @transform_6(%arg0: i32) -> (i32, i32, i32) {
    %c0_i32 = arith.constant 0 : i32
    %c0_i32_0 = arith.constant 0 : i32
    %c0_i32_1 = arith.constant 0 : i32
    return %arg0, %c0_i32, %c0_i32_0 : i32, i32, i32
  }
  func.func @transform_7(%arg0: i32) -> (i32, i32, i32) {
    %c0_i32 = arith.constant 0 : i32
    %c0_i32_0 = arith.constant 0 : i32
    %c0_i32_1 = arith.constant 0 : i32
    return %arg0, %c0_i32, %c0_i32_0 : i32, i32, i32
  }
  func.func @transform_8(%arg0: i32) -> (i32, i32, i32) {
    %c0_i32 = arith.constant 0 : i32
    %c0_i32_0 = arith.constant 0 : i32
    %c0_i32_1 = arith.constant 0 : i32
    return %arg0, %c0_i32, %c0_i32_0 : i32, i32, i32
  }
  func.func @transform_9(%arg0: i32) -> (i32, i32, i32) {
    %c0_i32 = arith.constant 0 : i32
    %c0_i32_0 = arith.constant 0 : i32
    %c0_i32_1 = arith.constant 0 : i32
    return %arg0, %c0_i32, %c0_i32_0 : i32, i32, i32
  }
  func.func @transform_10(%arg0: i32) -> (i32, i32) {
    %c0_i32 = arith.constant 0 : i32
    %c0_i32_0 = arith.constant 0 : i32
    %c0_i32_1 = arith.constant 0 : i32
    return %c0_i32, %c0_i32_0 : i32, i32
  }
}

module attributes {stable_mosaic.version = 11 : i64} {
  func.func @_set2set_out_kernel(%arg0: i32, %arg1: memref<16x32xf32, #tpu.memory_space<vmem>>, %arg2: memref<2x16xf32, #tpu.memory_space<vmem>>, %arg3: memref<4x32x32xf32, #tpu.memory_space<vmem>>, %arg4: memref<4x32x32xf32, #tpu.memory_space<vmem>>, %arg5: memref<4x1x32xf32, #tpu.memory_space<vmem>>, %arg6: memref<32x16xf32, #tpu.memory_space<vmem>>, %arg7: memref<32x16xf32, #tpu.memory_space<vmem>>, %arg8: memref<1x16xf32, #tpu.memory_space<vmem>>, %arg9: memref<2x16xf32, #tpu.memory_space<vmem>>) attributes {dimension_semantics = [#tpu.dimension_semantics<arbitrary>], iteration_bounds = array<i64: 1>, scalar_prefetch = 0 : i64, scratch_operands = 0 : i64, tpu.core_type = #tpu.core_type<tc>, window_params = [{pipeline_mode = #tpu.pipeline_mode<synchronous>, transform_indices = @transform_0, window_bounds = array<i64: 16, 32>}, {pipeline_mode = #tpu.pipeline_mode<synchronous>, transform_indices = @transform_1, window_bounds = array<i64: 2, 16>}, {pipeline_mode = #tpu.pipeline_mode<synchronous>, transform_indices = @transform_2, window_bounds = array<i64: 4, 32, 32>}, {pipeline_mode = #tpu.pipeline_mode<synchronous>, transform_indices = @transform_3, window_bounds = array<i64: 4, 32, 32>}, {pipeline_mode = #tpu.pipeline_mode<synchronous>, transform_indices = @transform_4, window_bounds = array<i64: 4, 1, 32>}, {pipeline_mode = #tpu.pipeline_mode<synchronous>, transform_indices = @transform_5, window_bounds = array<i64: 32, 16>}, {pipeline_mode = #tpu.pipeline_mode<synchronous>, transform_indices = @transform_6, window_bounds = array<i64: 32, 16>}, {pipeline_mode = #tpu.pipeline_mode<synchronous>, transform_indices = @transform_7, window_bounds = array<i64: 1, 16>}, {pipeline_mode = #tpu.pipeline_mode<synchronous>, transform_indices = @transform_8, window_bounds = array<i64: 2, 16>}]} {
    %c0 = arith.constant 0 : index
    %c0_0 = arith.constant 0 : index
    %0 = vector.load %arg1[%c0, %c0_0] : memref<16x32xf32, #tpu.memory_space<vmem>>, vector<16x32xf32>
    %c0_1 = arith.constant 0 : index
    %c0_2 = arith.constant 0 : index
    %1 = vector.load %arg2[%c0_1, %c0_2] : memref<2x16xf32, #tpu.memory_space<vmem>>, vector<2x16xf32>
    %cst = arith.constant 0.000000e+00 : f32
    %2 = vector.broadcast %cst : f32 to vector<2x32xf32>
    %cst_3 = arith.constant 0.000000e+00 : f32
    %3 = vector.broadcast %cst_3 : f32 to vector<2x32xf32>
    %cst_4 = arith.constant 0.000000e+00 : f32
    %4 = vector.broadcast %cst_4 : f32 to vector<2x32xf32>
    %c0_5 = arith.constant 0 : index
    %c0_6 = arith.constant 0 : index
    %c0_7 = arith.constant 0 : index
    %5 = vector.load %arg3[%c0_5, %c0_6, %c0_7] : memref<4x32x32xf32, #tpu.memory_space<vmem>>, vector<1x32x32xf32>
    %6 = vector.shape_cast %5 : vector<1x32x32xf32> to vector<32x32xf32>
    %cst_8 = arith.constant dense<0.000000e+00> : vector<2x32xf32>
    %7 = tpu.matmul %2, %6, %cst_8 {dimension_numbers = #tpu.dot_dimension_numbers<[1], [0], [0], [1], [0, 0, 1, 1], [], []>} : vector<2x32xf32>, vector<32x32xf32>, vector<2x32xf32> -> vector<2x32xf32>
    %c0_9 = arith.constant 0 : index
    %c0_10 = arith.constant 0 : index
    %c0_11 = arith.constant 0 : index
    %8 = vector.load %arg4[%c0_9, %c0_10, %c0_11] : memref<4x32x32xf32, #tpu.memory_space<vmem>>, vector<1x32x32xf32>
    %9 = vector.shape_cast %8 : vector<1x32x32xf32> to vector<32x32xf32>
    %cst_12 = arith.constant dense<0.000000e+00> : vector<2x32xf32>
    %10 = tpu.matmul %4, %9, %cst_12 {dimension_numbers = #tpu.dot_dimension_numbers<[1], [0], [0], [1], [0, 0, 1, 1], [], []>} : vector<2x32xf32>, vector<32x32xf32>, vector<2x32xf32> -> vector<2x32xf32>
    %11 = arith.addf %7, %10 : vector<2x32xf32>
    %c0_13 = arith.constant 0 : index
    %c0_14 = arith.constant 0 : index
    %c0_15 = arith.constant 0 : index
    %12 = vector.load %arg5[%c0_13, %c0_14, %c0_15] : memref<4x1x32xf32, #tpu.memory_space<vmem>>, vector<1x1x32xf32>
    %13 = vector.shape_cast %12 : vector<1x1x32xf32> to vector<1x32xf32>
    %14 = vector.broadcast %13 : vector<1x32xf32> to vector<2x32xf32>
    %15 = arith.addf %11, %14 : vector<2x32xf32>
    %16 = arith.negf %15 : vector<2x32xf32>
    %17 = math.exp %16 : vector<2x32xf32>
    %cst_16 = arith.constant 1.000000e+00 : f32
    %18 = vector.broadcast %cst_16 : f32 to vector<2x32xf32>
    %19 = arith.addf %18, %17 : vector<2x32xf32>
    %20 = arith.divf %18, %19 : vector<2x32xf32>
    %c1 = arith.constant 1 : index
    %c0_17 = arith.constant 0 : index
    %c0_18 = arith.constant 0 : index
    %21 = vector.load %arg3[%c1, %c0_17, %c0_18] : memref<4x32x32xf32, #tpu.memory_space<vmem>>, vector<1x32x32xf32>
    %22 = vector.shape_cast %21 : vector<1x32x32xf32> to vector<32x32xf32>
    %cst_19 = arith.constant dense<0.000000e+00> : vector<2x32xf32>
    %23 = tpu.matmul %2, %22, %cst_19 {dimension_numbers = #tpu.dot_dimension_numbers<[1], [0], [0], [1], [0, 0, 1, 1], [], []>} : vector<2x32xf32>, vector<32x32xf32>, vector<2x32xf32> -> vector<2x32xf32>
    %c1_20 = arith.constant 1 : index
    %c0_21 = arith.constant 0 : index
    %c0_22 = arith.constant 0 : index
    %24 = vector.load %arg4[%c1_20, %c0_21, %c0_22] : memref<4x32x32xf32, #tpu.memory_space<vmem>>, vector<1x32x32xf32>
    %25 = vector.shape_cast %24 : vector<1x32x32xf32> to vector<32x32xf32>
    %cst_23 = arith.constant dense<0.000000e+00> : vector<2x32xf32>
    %26 = tpu.matmul %4, %25, %cst_23 {dimension_numbers = #tpu.dot_dimension_numbers<[1], [0], [0], [1], [0, 0, 1, 1], [], []>} : vector<2x32xf32>, vector<32x32xf32>, vector<2x32xf32> -> vector<2x32xf32>
    %27 = arith.addf %23, %26 : vector<2x32xf32>
    %c1_24 = arith.constant 1 : index
    %c0_25 = arith.constant 0 : index
    %c0_26 = arith.constant 0 : index
    %28 = vector.load %arg5[%c1_24, %c0_25, %c0_26] : memref<4x1x32xf32, #tpu.memory_space<vmem>>, vector<1x1x32xf32>
    %29 = vector.shape_cast %28 : vector<1x1x32xf32> to vector<1x32xf32>
    %30 = vector.broadcast %29 : vector<1x32xf32> to vector<2x32xf32>
    %31 = arith.addf %27, %30 : vector<2x32xf32>
    %32 = arith.negf %31 : vector<2x32xf32>
    %33 = math.exp %32 : vector<2x32xf32>
    %cst_27 = arith.constant 1.000000e+00 : f32
    %34 = vector.broadcast %cst_27 : f32 to vector<2x32xf32>
    %35 = arith.addf %34, %33 : vector<2x32xf32>
    %36 = arith.divf %34, %35 : vector<2x32xf32>
    %c2 = arith.constant 2 : index
    %c0_28 = arith.constant 0 : index
    %c0_29 = arith.constant 0 : index
    %37 = vector.load %arg3[%c2, %c0_28, %c0_29] : memref<4x32x32xf32, #tpu.memory_space<vmem>>, vector<1x32x32xf32>
    %38 = vector.shape_cast %37 : vector<1x32x32xf32> to vector<32x32xf32>
    %cst_30 = arith.constant dense<0.000000e+00> : vector<2x32xf32>
    %39 = tpu.matmul %2, %38, %cst_30 {dimension_numbers = #tpu.dot_dimension_numbers<[1], [0], [0], [1], [0, 0, 1, 1], [], []>} : vector<2x32xf32>, vector<32x32xf32>, vector<2x32xf32> -> vector<2x32xf32>
    %c2_31 = arith.constant 2 : index
    %c0_32 = arith.constant 0 : index
    %c0_33 = arith.constant 0 : index
    %40 = vector.load %arg4[%c2_31, %c0_32, %c0_33] : memref<4x32x32xf32, #tpu.memory_space<vmem>>, vector<1x32x32xf32>
    %41 = vector.shape_cast %40 : vector<1x32x32xf32> to vector<32x32xf32>
    %cst_34 = arith.constant dense<0.000000e+00> : vector<2x32xf32>
    %42 = tpu.matmul %4, %41, %cst_34 {dimension_numbers = #tpu.dot_dimension_numbers<[1], [0], [0], [1], [0, 0, 1, 1], [], []>} : vector<2x32xf32>, vector<32x32xf32>, vector<2x32xf32> -> vector<2x32xf32>
    %43 = arith.addf %39, %42 : vector<2x32xf32>
    %c2_35 = arith.constant 2 : index
    %c0_36 = arith.constant 0 : index
    %c0_37 = arith.constant 0 : index
    %44 = vector.load %arg5[%c2_35, %c0_36, %c0_37] : memref<4x1x32xf32, #tpu.memory_space<vmem>>, vector<1x1x32xf32>
    %45 = vector.shape_cast %44 : vector<1x1x32xf32> to vector<1x32xf32>
    %46 = vector.broadcast %45 : vector<1x32xf32> to vector<2x32xf32>
    %47 = arith.addf %43, %46 : vector<2x32xf32>
    %48 = math.tanh %47 : vector<2x32xf32>
    %c3 = arith.constant 3 : index
    %c0_38 = arith.constant 0 : index
    %c0_39 = arith.constant 0 : index
    %49 = vector.load %arg3[%c3, %c0_38, %c0_39] : memref<4x32x32xf32, #tpu.memory_space<vmem>>, vector<1x32x32xf32>
    %50 = vector.shape_cast %49 : vector<1x32x32xf32> to vector<32x32xf32>
    %cst_40 = arith.constant dense<0.000000e+00> : vector<2x32xf32>
    %51 = tpu.matmul %2, %50, %cst_40 {dimension_numbers = #tpu.dot_dimension_numbers<[1], [0], [0], [1], [0, 0, 1, 1], [], []>} : vector<2x32xf32>, vector<32x32xf32>, vector<2x32xf32> -> vector<2x32xf32>
    %c3_41 = arith.constant 3 : index
    %c0_42 = arith.constant 0 : index
    %c0_43 = arith.constant 0 : index
    %52 = vector.load %arg4[%c3_41, %c0_42, %c0_43] : memref<4x32x32xf32, #tpu.memory_space<vmem>>, vector<1x32x32xf32>
    %53 = vector.shape_cast %52 : vector<1x32x32xf32> to vector<32x32xf32>
    %cst_44 = arith.constant dense<0.000000e+00> : vector<2x32xf32>
    %54 = tpu.matmul %4, %53, %cst_44 {dimension_numbers = #tpu.dot_dimension_numbers<[1], [0], [0], [1], [0, 0, 1, 1], [], []>} : vector<2x32xf32>, vector<32x32xf32>, vector<2x32xf32> -> vector<2x32xf32>
    %55 = arith.addf %51, %54 : vector<2x32xf32>
    %c3_45 = arith.constant 3 : index
    %c0_46 = arith.constant 0 : index
    %c0_47 = arith.constant 0 : index
    %56 = vector.load %arg5[%c3_45, %c0_46, %c0_47] : memref<4x1x32xf32, #tpu.memory_space<vmem>>, vector<1x1x32xf32>
    %57 = vector.shape_cast %56 : vector<1x1x32xf32> to vector<1x32xf32>
    %58 = vector.broadcast %57 : vector<1x32xf32> to vector<2x32xf32>
    %59 = arith.addf %55, %58 : vector<2x32xf32>
    %60 = arith.negf %59 : vector<2x32xf32>
    %61 = math.exp %60 : vector<2x32xf32>
    %cst_48 = arith.constant 1.000000e+00 : f32
    %62 = vector.broadcast %cst_48 : f32 to vector<2x32xf32>
    %63 = arith.addf %62, %61 : vector<2x32xf32>
    %64 = arith.divf %62, %63 : vector<2x32xf32>
    %65 = arith.mulf %36, %3 : vector<2x32xf32>
    %66 = arith.mulf %20, %48 : vector<2x32xf32>
    %67 = arith.addf %65, %66 : vector<2x32xf32>
    %68 = math.tanh %67 : vector<2x32xf32>
    %69 = arith.mulf %64, %68 : vector<2x32xf32>
    %cst_49 = arith.constant dense<0.000000e+00> : vector<2x16xf32>
    %70 = tpu.matmul %69, %0, %cst_49 {dimension_numbers = #tpu.dot_dimension_numbers<[1], [1], [0], [0], [0, 0, 1, 0], [], []>} : vector<2x32xf32>, vector<16x32xf32>, vector<2x16xf32> -> vector<2x16xf32>
    %cst_50 = arith.constant 0.000000e+00 : f32
    %71 = vector.broadcast %cst_50 : f32 to vector<2x16xf32>
    %72 = arith.cmpf ogt, %1, %71 : vector<2x16xf32>
    %cst_51 = arith.constant -1.000000e+30 : f32
    %73 = vector.broadcast %cst_51 : f32 to vector<2x16xf32>
    %74 = arith.select %72, %70, %73 : vector<2x16xi1>, vector<2x16xf32>
    %cst_52 = arith.constant dense<0xFF800000> : vector<2xf32>
    %75 = vector.multi_reduction <maximumf>, %74, %cst_52 [1] : vector<2x16xf32> to vector<2xf32>
    %76 = vector.shape_cast %75 : vector<2xf32> to vector<2x1xf32>
    %77 = vector.broadcast %76 : vector<2x1xf32> to vector<2x16xf32>
    %78 = arith.subf %74, %77 : vector<2x16xf32>
    %79 = math.exp %78 : vector<2x16xf32>
    %80 = arith.mulf %79, %1 : vector<2x16xf32>
    %cst_53 = arith.constant dense<0.000000e+00> : vector<2xf32>
    %81 = vector.multi_reduction <add>, %80, %cst_53 [1] : vector<2x16xf32> to vector<2xf32>
    %82 = vector.shape_cast %81 : vector<2xf32> to vector<2x1xf32>
    %cst_54 = arith.constant 9.99999996E-13 : f32
    %83 = vector.broadcast %cst_54 : f32 to vector<2x1xf32>
    %84 = arith.maximumf %82, %83 : vector<2x1xf32>
    %85 = vector.broadcast %84 : vector<2x1xf32> to vector<2x16xf32>
    %86 = arith.divf %80, %85 : vector<2x16xf32>
    %cst_55 = arith.constant dense<0.000000e+00> : vector<2x32xf32>
    %87 = tpu.matmul %86, %0, %cst_55 {dimension_numbers = #tpu.dot_dimension_numbers<[1], [0], [0], [1], [0, 0, 1, 1], [], []>} : vector<2x16xf32>, vector<16x32xf32>, vector<2x32xf32> -> vector<2x32xf32>
    %c0_56 = arith.constant 0 : index
    %c0_57 = arith.constant 0 : index
    %c0_58 = arith.constant 0 : index
    %88 = vector.load %arg3[%c0_56, %c0_57, %c0_58] : memref<4x32x32xf32, #tpu.memory_space<vmem>>, vector<1x32x32xf32>
    %89 = vector.shape_cast %88 : vector<1x32x32xf32> to vector<32x32xf32>
    %cst_59 = arith.constant dense<0.000000e+00> : vector<2x32xf32>
    %90 = tpu.matmul %69, %89, %cst_59 {dimension_numbers = #tpu.dot_dimension_numbers<[1], [0], [0], [1], [0, 0, 1, 1], [], []>} : vector<2x32xf32>, vector<32x32xf32>, vector<2x32xf32> -> vector<2x32xf32>
    %c0_60 = arith.constant 0 : index
    %c0_61 = arith.constant 0 : index
    %c0_62 = arith.constant 0 : index
    %91 = vector.load %arg4[%c0_60, %c0_61, %c0_62] : memref<4x32x32xf32, #tpu.memory_space<vmem>>, vector<1x32x32xf32>
    %92 = vector.shape_cast %91 : vector<1x32x32xf32> to vector<32x32xf32>
    %cst_63 = arith.constant dense<0.000000e+00> : vector<2x32xf32>
    %93 = tpu.matmul %87, %92, %cst_63 {dimension_numbers = #tpu.dot_dimension_numbers<[1], [0], [0], [1], [0, 0, 1, 1], [], []>} : vector<2x32xf32>, vector<32x32xf32>, vector<2x32xf32> -> vector<2x32xf32>
    %94 = arith.addf %90, %93 : vector<2x32xf32>
    %c0_64 = arith.constant 0 : index
    %c0_65 = arith.constant 0 : index
    %c0_66 = arith.constant 0 : index
    %95 = vector.load %arg5[%c0_64, %c0_65, %c0_66] : memref<4x1x32xf32, #tpu.memory_space<vmem>>, vector<1x1x32xf32>
    %96 = vector.shape_cast %95 : vector<1x1x32xf32> to vector<1x32xf32>
    %97 = vector.broadcast %96 : vector<1x32xf32> to vector<2x32xf32>
    %98 = arith.addf %94, %97 : vector<2x32xf32>
    %99 = arith.negf %98 : vector<2x32xf32>
    %100 = math.exp %99 : vector<2x32xf32>
    %cst_67 = arith.constant 1.000000e+00 : f32
    %101 = vector.broadcast %cst_67 : f32 to vector<2x32xf32>
    %102 = arith.addf %101, %100 : vector<2x32xf32>
    %103 = arith.divf %101, %102 : vector<2x32xf32>
    %c1_68 = arith.constant 1 : index
    %c0_69 = arith.constant 0 : index
    %c0_70 = arith.constant 0 : index
    %104 = vector.load %arg3[%c1_68, %c0_69, %c0_70] : memref<4x32x32xf32, #tpu.memory_space<vmem>>, vector<1x32x32xf32>
    %105 = vector.shape_cast %104 : vector<1x32x32xf32> to vector<32x32xf32>
    %cst_71 = arith.constant dense<0.000000e+00> : vector<2x32xf32>
    %106 = tpu.matmul %69, %105, %cst_71 {dimension_numbers = #tpu.dot_dimension_numbers<[1], [0], [0], [1], [0, 0, 1, 1], [], []>} : vector<2x32xf32>, vector<32x32xf32>, vector<2x32xf32> -> vector<2x32xf32>
    %c1_72 = arith.constant 1 : index
    %c0_73 = arith.constant 0 : index
    %c0_74 = arith.constant 0 : index
    %107 = vector.load %arg4[%c1_72, %c0_73, %c0_74] : memref<4x32x32xf32, #tpu.memory_space<vmem>>, vector<1x32x32xf32>
    %108 = vector.shape_cast %107 : vector<1x32x32xf32> to vector<32x32xf32>
    %cst_75 = arith.constant dense<0.000000e+00> : vector<2x32xf32>
    %109 = tpu.matmul %87, %108, %cst_75 {dimension_numbers = #tpu.dot_dimension_numbers<[1], [0], [0], [1], [0, 0, 1, 1], [], []>} : vector<2x32xf32>, vector<32x32xf32>, vector<2x32xf32> -> vector<2x32xf32>
    %110 = arith.addf %106, %109 : vector<2x32xf32>
    %c1_76 = arith.constant 1 : index
    %c0_77 = arith.constant 0 : index
    %c0_78 = arith.constant 0 : index
    %111 = vector.load %arg5[%c1_76, %c0_77, %c0_78] : memref<4x1x32xf32, #tpu.memory_space<vmem>>, vector<1x1x32xf32>
    %112 = vector.shape_cast %111 : vector<1x1x32xf32> to vector<1x32xf32>
    %113 = vector.broadcast %112 : vector<1x32xf32> to vector<2x32xf32>
    %114 = arith.addf %110, %113 : vector<2x32xf32>
    %115 = arith.negf %114 : vector<2x32xf32>
    %116 = math.exp %115 : vector<2x32xf32>
    %cst_79 = arith.constant 1.000000e+00 : f32
    %117 = vector.broadcast %cst_79 : f32 to vector<2x32xf32>
    %118 = arith.addf %117, %116 : vector<2x32xf32>
    %119 = arith.divf %117, %118 : vector<2x32xf32>
    %c2_80 = arith.constant 2 : index
    %c0_81 = arith.constant 0 : index
    %c0_82 = arith.constant 0 : index
    %120 = vector.load %arg3[%c2_80, %c0_81, %c0_82] : memref<4x32x32xf32, #tpu.memory_space<vmem>>, vector<1x32x32xf32>
    %121 = vector.shape_cast %120 : vector<1x32x32xf32> to vector<32x32xf32>
    %cst_83 = arith.constant dense<0.000000e+00> : vector<2x32xf32>
    %122 = tpu.matmul %69, %121, %cst_83 {dimension_numbers = #tpu.dot_dimension_numbers<[1], [0], [0], [1], [0, 0, 1, 1], [], []>} : vector<2x32xf32>, vector<32x32xf32>, vector<2x32xf32> -> vector<2x32xf32>
    %c2_84 = arith.constant 2 : index
    %c0_85 = arith.constant 0 : index
    %c0_86 = arith.constant 0 : index
    %123 = vector.load %arg4[%c2_84, %c0_85, %c0_86] : memref<4x32x32xf32, #tpu.memory_space<vmem>>, vector<1x32x32xf32>
    %124 = vector.shape_cast %123 : vector<1x32x32xf32> to vector<32x32xf32>
    %cst_87 = arith.constant dense<0.000000e+00> : vector<2x32xf32>
    %125 = tpu.matmul %87, %124, %cst_87 {dimension_numbers = #tpu.dot_dimension_numbers<[1], [0], [0], [1], [0, 0, 1, 1], [], []>} : vector<2x32xf32>, vector<32x32xf32>, vector<2x32xf32> -> vector<2x32xf32>
    %126 = arith.addf %122, %125 : vector<2x32xf32>
    %c2_88 = arith.constant 2 : index
    %c0_89 = arith.constant 0 : index
    %c0_90 = arith.constant 0 : index
    %127 = vector.load %arg5[%c2_88, %c0_89, %c0_90] : memref<4x1x32xf32, #tpu.memory_space<vmem>>, vector<1x1x32xf32>
    %128 = vector.shape_cast %127 : vector<1x1x32xf32> to vector<1x32xf32>
    %129 = vector.broadcast %128 : vector<1x32xf32> to vector<2x32xf32>
    %130 = arith.addf %126, %129 : vector<2x32xf32>
    %131 = math.tanh %130 : vector<2x32xf32>
    %c3_91 = arith.constant 3 : index
    %c0_92 = arith.constant 0 : index
    %c0_93 = arith.constant 0 : index
    %132 = vector.load %arg3[%c3_91, %c0_92, %c0_93] : memref<4x32x32xf32, #tpu.memory_space<vmem>>, vector<1x32x32xf32>
    %133 = vector.shape_cast %132 : vector<1x32x32xf32> to vector<32x32xf32>
    %cst_94 = arith.constant dense<0.000000e+00> : vector<2x32xf32>
    %134 = tpu.matmul %69, %133, %cst_94 {dimension_numbers = #tpu.dot_dimension_numbers<[1], [0], [0], [1], [0, 0, 1, 1], [], []>} : vector<2x32xf32>, vector<32x32xf32>, vector<2x32xf32> -> vector<2x32xf32>
    %c3_95 = arith.constant 3 : index
    %c0_96 = arith.constant 0 : index
    %c0_97 = arith.constant 0 : index
    %135 = vector.load %arg4[%c3_95, %c0_96, %c0_97] : memref<4x32x32xf32, #tpu.memory_space<vmem>>, vector<1x32x32xf32>
    %136 = vector.shape_cast %135 : vector<1x32x32xf32> to vector<32x32xf32>
    %cst_98 = arith.constant dense<0.000000e+00> : vector<2x32xf32>
    %137 = tpu.matmul %87, %136, %cst_98 {dimension_numbers = #tpu.dot_dimension_numbers<[1], [0], [0], [1], [0, 0, 1, 1], [], []>} : vector<2x32xf32>, vector<32x32xf32>, vector<2x32xf32> -> vector<2x32xf32>
    %138 = arith.addf %134, %137 : vector<2x32xf32>
    %c3_99 = arith.constant 3 : index
    %c0_100 = arith.constant 0 : index
    %c0_101 = arith.constant 0 : index
    %139 = vector.load %arg5[%c3_99, %c0_100, %c0_101] : memref<4x1x32xf32, #tpu.memory_space<vmem>>, vector<1x1x32xf32>
    %140 = vector.shape_cast %139 : vector<1x1x32xf32> to vector<1x32xf32>
    %141 = vector.broadcast %140 : vector<1x32xf32> to vector<2x32xf32>
    %142 = arith.addf %138, %141 : vector<2x32xf32>
    %143 = arith.negf %142 : vector<2x32xf32>
    %144 = math.exp %143 : vector<2x32xf32>
    %cst_102 = arith.constant 1.000000e+00 : f32
    %145 = vector.broadcast %cst_102 : f32 to vector<2x32xf32>
    %146 = arith.addf %145, %144 : vector<2x32xf32>
    %147 = arith.divf %145, %146 : vector<2x32xf32>
    %148 = arith.mulf %119, %67 : vector<2x32xf32>
    %149 = arith.mulf %103, %131 : vector<2x32xf32>
    %150 = arith.addf %148, %149 : vector<2x32xf32>
    %151 = math.tanh %150 : vector<2x32xf32>
    %152 = arith.mulf %147, %151 : vector<2x32xf32>
    %cst_103 = arith.constant dense<0.000000e+00> : vector<2x16xf32>
    %153 = tpu.matmul %152, %0, %cst_103 {dimension_numbers = #tpu.dot_dimension_numbers<[1], [1], [0], [0], [0, 0, 1, 0], [], []>} : vector<2x32xf32>, vector<16x32xf32>, vector<2x16xf32> -> vector<2x16xf32>
    %cst_104 = arith.constant 0.000000e+00 : f32
    %154 = vector.broadcast %cst_104 : f32 to vector<2x16xf32>
    %155 = arith.cmpf ogt, %1, %154 : vector<2x16xf32>
    %cst_105 = arith.constant -1.000000e+30 : f32
    %156 = vector.broadcast %cst_105 : f32 to vector<2x16xf32>
    %157 = arith.select %155, %153, %156 : vector<2x16xi1>, vector<2x16xf32>
    %cst_106 = arith.constant dense<0xFF800000> : vector<2xf32>
    %158 = vector.multi_reduction <maximumf>, %157, %cst_106 [1] : vector<2x16xf32> to vector<2xf32>
    %159 = vector.shape_cast %158 : vector<2xf32> to vector<2x1xf32>
    %160 = vector.broadcast %159 : vector<2x1xf32> to vector<2x16xf32>
    %161 = arith.subf %157, %160 : vector<2x16xf32>
    %162 = math.exp %161 : vector<2x16xf32>
    %163 = arith.mulf %162, %1 : vector<2x16xf32>
    %cst_107 = arith.constant dense<0.000000e+00> : vector<2xf32>
    %164 = vector.multi_reduction <add>, %163, %cst_107 [1] : vector<2x16xf32> to vector<2xf32>
    %165 = vector.shape_cast %164 : vector<2xf32> to vector<2x1xf32>
    %cst_108 = arith.constant 9.99999996E-13 : f32
    %166 = vector.broadcast %cst_108 : f32 to vector<2x1xf32>
    %167 = arith.maximumf %165, %166 : vector<2x1xf32>
    %168 = vector.broadcast %167 : vector<2x1xf32> to vector<2x16xf32>
    %169 = arith.divf %163, %168 : vector<2x16xf32>
    %cst_109 = arith.constant dense<0.000000e+00> : vector<2x32xf32>
    %170 = tpu.matmul %169, %0, %cst_109 {dimension_numbers = #tpu.dot_dimension_numbers<[1], [0], [0], [1], [0, 0, 1, 1], [], []>} : vector<2x16xf32>, vector<16x32xf32>, vector<2x32xf32> -> vector<2x32xf32>
    %c0_110 = arith.constant 0 : index
    %c0_111 = arith.constant 0 : index
    %171 = vector.load %arg6[%c0_110, %c0_111] : memref<32x16xf32, #tpu.memory_space<vmem>>, vector<32x16xf32>
    %cst_112 = arith.constant dense<0.000000e+00> : vector<2x16xf32>
    %172 = tpu.matmul %152, %171, %cst_112 {dimension_numbers = #tpu.dot_dimension_numbers<[1], [0], [0], [1], [0, 0, 1, 1], [], []>} : vector<2x32xf32>, vector<32x16xf32>, vector<2x16xf32> -> vector<2x16xf32>
    %c0_113 = arith.constant 0 : index
    %c0_114 = arith.constant 0 : index
    %173 = vector.load %arg7[%c0_113, %c0_114] : memref<32x16xf32, #tpu.memory_space<vmem>>, vector<32x16xf32>
    %cst_115 = arith.constant dense<0.000000e+00> : vector<2x16xf32>
    %174 = tpu.matmul %170, %173, %cst_115 {dimension_numbers = #tpu.dot_dimension_numbers<[1], [0], [0], [1], [0, 0, 1, 1], [], []>} : vector<2x32xf32>, vector<32x16xf32>, vector<2x16xf32> -> vector<2x16xf32>
    %175 = arith.addf %172, %174 : vector<2x16xf32>
    %c0_116 = arith.constant 0 : index
    %c0_117 = arith.constant 0 : index
    %176 = vector.load %arg8[%c0_116, %c0_117] : memref<1x16xf32, #tpu.memory_space<vmem>>, vector<1x16xf32>
    %177 = vector.broadcast %176 : vector<1x16xf32> to vector<2x16xf32>
    %178 = arith.addf %175, %177 : vector<2x16xf32>
    %c0_118 = arith.constant 0 : index
    %c0_119 = arith.constant 0 : index
    %179 = vector.load %arg9[%c0_118, %c0_119] : memref<2x16xf32, #tpu.memory_space<vmem>>, vector<2x16xf32>
    tpu.vector_store %arg9[%c0_118, %c0_119], %178 {strides = array<i32>} : memref<2x16xf32, #tpu.memory_space<vmem>>, vector<2x16xf32>,
    return
  }
  func.func @transform_0(%arg0: i32) -> (i32, i32) {
    %c0_i32 = arith.constant 0 : i32
    %c0_i32_0 = arith.constant 0 : i32
    %c0_i32_1 = arith.constant 0 : i32
    return %c0_i32, %c0_i32_0 : i32, i32
  }
  func.func @transform_1(%arg0: i32) -> (i32, i32) {
    %c0_i32 = arith.constant 0 : i32
    %c0_i32_0 = arith.constant 0 : i32
    %c0_i32_1 = arith.constant 0 : i32
    return %c0_i32, %c0_i32_0 : i32, i32
  }
  func.func @transform_2(%arg0: i32) -> (i32, i32, i32) {
    %c0_i32 = arith.constant 0 : i32
    %c0_i32_0 = arith.constant 0 : i32
    %c0_i32_1 = arith.constant 0 : i32
    %c0_i32_2 = arith.constant 0 : i32
    return %c0_i32, %c0_i32_0, %c0_i32_1 : i32, i32, i32
  }
  func.func @transform_3(%arg0: i32) -> (i32, i32, i32) {
    %c0_i32 = arith.constant 0 : i32
    %c0_i32_0 = arith.constant 0 : i32
    %c0_i32_1 = arith.constant 0 : i32
    %c0_i32_2 = arith.constant 0 : i32
    return %c0_i32, %c0_i32_0, %c0_i32_1 : i32, i32, i32
  }
  func.func @transform_4(%arg0: i32) -> (i32, i32, i32) {
    %c0_i32 = arith.constant 0 : i32
    %c0_i32_0 = arith.constant 0 : i32
    %c0_i32_1 = arith.constant 0 : i32
    %c0_i32_2 = arith.constant 0 : i32
    return %c0_i32, %c0_i32_0, %c0_i32_1 : i32, i32, i32
  }
  func.func @transform_5(%arg0: i32) -> (i32, i32) {
    %c0_i32 = arith.constant 0 : i32
    %c0_i32_0 = arith.constant 0 : i32
    %c0_i32_1 = arith.constant 0 : i32
    return %c0_i32, %c0_i32_0 : i32, i32
  }
  func.func @transform_6(%arg0: i32) -> (i32, i32) {
    %c0_i32 = arith.constant 0 : i32
    %c0_i32_0 = arith.constant 0 : i32
    %c0_i32_1 = arith.constant 0 : i32
    return %c0_i32, %c0_i32_0 : i32, i32
  }
  func.func @transform_7(%arg0: i32) -> (i32, i32) {
    %c0_i32 = arith.constant 0 : i32
    %c0_i32_0 = arith.constant 0 : i32
    %c0_i32_1 = arith.constant 0 : i32
    return %c0_i32, %c0_i32_0 : i32, i32
  }
  func.func @transform_8(%arg0: i32) -> (i32, i32) {
    %c0_i32 = arith.constant 0 : i32
    %c0_i32_0 = arith.constant 0 : i32
    %c0_i32_1 = arith.constant 0 : i32
    return %c0_i32, %c0_i32_0 : i32, i32
  }
}

</mosaic_0001>

<bundles_post_ra>
// kernel: extractor_forward.2
= control target key start
LH: loop header
LB: loop body
LE: loop exit
PB: predicated region body
PF: predicated region fallthrough
CT: control target
= control target key end

     0   :  { %15 = vsyncpa [#allocation5], 0  ;;  %s1518_s0 = inlined_call_operand.vmem [shape: f32[16,8], index: 0, kind: input, shape index: {}]   ;;  %s1519_s1 = inlined_call_operand.vmem [shape: f32[8,32], index: 1, kind: input, shape index: {}]   ;;  %s1520_s2 = inlined_call_operand.vmem [shape: f32[1,32], index: 2, kind: input, shape index: {}]   ;;  %s1521_s3 = inlined_call_operand.vmem [shape: f32[16,16], index: 3, kind: input, shape index: {}]   ;;  %s1522_s4 = inlined_call_operand.vmem [shape: f32[2], index: 4, kind: input, shape index: {}]   ;;  %s1523_s5 = inlined_call_operand.vmem [shape: f32[2], index: 5, kind: input, shape index: {}]   ;;  %s1524_s6 = inlined_call_operand.vmem [shape: f32[2,32,64], index: 6, kind: input, shape index: {}]   ;;  %s1525_s7 = inlined_call_operand.vmem [shape: f32[2,1,64], index: 7, kind: input, shape index: {}]   ;;  %s1526_s8 = inlined_call_operand.vmem [shape: f32[2,64,32], index: 8, kind: input, shape index: {}]   ;;  %s1527_s9 = inlined_call_operand.vmem [shape: f32[2,1,32], index: 9, kind: input, shape index: {}]   ;;  %s1528_s10 = inlined_call_operand.vmem [shape: f32[16,32], index: 10, kind: output, shape index: {}]  }
   0x1   :  { %16 = vsyncpa [#allocation7], 0  ;;  %s1354_s13 = smov 0  }
   0x2 LB: > { %s1360_s14 = sadd.s32 4294967295, %s1294_s13   ;;  %p1062_p0 = scmp.ge.s32.totalorder %s1294_s13, 1  ;;  %s1294_s13 = sphi %s1354_s13, %s22_s13  }
   0x3   : > { %p278_p1 = scmp.lt.s32.totalorder %s1294_s13, 3  ;;  %s303_s17 = sshll.u32 %s1522_s4, 4  ;;  %s304_s17 = int_to_ptr.vmem [resolvable:$true] %s303_s17 }
   0x4   : > { %p1529_p4 = scmp.eq.s32.totalorder %s1360_s14, 0  ;;  %s314_s21 = sshll.u32 %s1523_s5, 4  ;;  %s315_s21 = int_to_ptr.vmem [resolvable:$true] %s314_s21 }
   0x5   : > { %p1368_p3 = pnand %p1062_p0, %p278_p1  ;;  %s1250_s23 = scalar_lea.vmem %s304_s17, 16 }
   0x6   : > { %p1251_p7 = scmp.ne.s32.totalorder %s304_s17, %s1250_s23  ;;  %p1258_p11 = scmp.lt.s32.totalorder %s304_s17, %s304_s17 }
   0x7   : > { %s1531_s18 = scalar_select %p1368_p3, 1, 0 }
   0x8   : > { %p1208_p5 = pneg %p1368_p3  ;;  %p1259_p12 = scmp.lt.s32.totalorder %s1250_s23, %s1250_s23 }
   0xa   : > { %p1380_p6 = pnand %p1529_p4, %p1208_p5  ;;  %p1260_p13 = por %p1259_p12, %p1258_p11 }
   0xc   : > { %p1252_p8 = pneg %p1380_p6 }
   0xe   : > { %p1253_p9 = pnand %p1252_p8, %p1251_p7 }
  0x10   : > { %p1254_p10 = pneg %p1253_p9 }
  0x12   : > { %p1261_p0 = pnand %p1260_p13, %p1254_p10 }
  0x14   : > { %1264 = shalt.err (!%p1261_p0)
}
  0x15   : > { %s1296_s24 = smov [#allocation4]   ;;  %s1265_s25 = scalar_lea.vmem %s315_s21, 16 }
  0x16   : > { %1211 = dma.vmem_to_smem (!%p1380_p6), %s304_s17, 16, %s1296_s24, [#allocation5]  }
  0x17   : > { %p1266_p1 = scmp.ne.s32.totalorder %s315_s21, %s1265_s25  ;;  %p1273_p4 = scmp.lt.s32.totalorder %s315_s21, %s315_s21 }
  0x18   : > { %p1274_p3 = scmp.lt.s32.totalorder %s1265_s25, %s1265_s25 }
  0x19   : > { %p1268_p5 = pnand %p1266_p1, %p1252_p8 }
  0x1a   : > { %p1275_p7 = por %p1274_p3, %p1273_p4 }
  0x1b   : > { %p1269_p2 = pneg %p1268_p5 }
  0x1d   : > { %p1276_p9 = pnand %p1275_p7, %p1269_p2 }
  0x1f   : > { %1279 = shalt.err (!%p1276_p9)
}
  0x20   : > { %s1297_s26 = smov [#allocation6]   ;;  %p1533_p10 = scmp.ne.s32.totalorder %s1531_s18, 0 }
  0x21   : > { %1214 = dma.vmem_to_smem (!%p1380_p6), %s315_s21, 16, %s1297_s26, [#allocation7]  }
  0x22   : > { %355 = sbr.rel (%p1533_p10) target bundleno = 1184 (0x4a0), region = 60  ;;  %p1534_p11 = scmp.eq.s32.totalorder (!%p1533_p10), %s1360_s14, 0 }
  0x29   : > { %1285 = dma.done.wait (%p1534_p11), [#allocation5], 16   ;;  %p1535_p12 = pmov %p1534_p11 }
  0x2a   : > { %p1536_p8 = pmov %p1534_p11 }
  0x2b   : > { %1287 = vsyncadd (%p1535_p12), [#allocation5], 4294967280 }
  0x2c   : > { %1289 = dma.done.wait (%p1536_p8), [#allocation7], 16   ;;  %p1537_p3 = pmov %p1536_p8 }
  0x2e   : > { %1291 = vsyncadd (%p1537_p3), [#allocation7], 4294967280 }
  0x2f   : > { %365 = sfence }
  0x30   : > { %p404_p2 = scmp.lt.s32.totalorder %s1360_s14, 1  ;;  %p1538_p4 = scmp.ne.s32.totalorder %s1360_s14, 0 }
  0x31   : > { %v426_v0 = vld [vmem:[%s1519_s1] sm:$0xff] (!%p1538_p4)  ;;  %vm434_vm0 = vcmask (!%p1538_p4), 64512   ;;  %v425_v2 = vld [vmem:[%s1518_s0 + $0x8] sm:$0xff] (!%p1538_p4)  ;;  %vm516_vm1 = vcmask (!%p1538_p4), 261120   ;;  %v1298_v3 = vmov (!%p1538_p4), -inf  }
  0x32   : > { %s1402_s27 = scalar_select %p404_p2, %s1360_s14, 1 }
  0x33   : > { %423 = sbr.rel (%p1538_p4) target bundleno = 269 (0x10d), region = 72  ;;  %v424_v1 = vld [vmem:[%s1518_s0] sm:$0xff] (!%p1538_p4)  ;;  %1119 = vmatprep.subr.mxu0 (!%p1538_p4), %v426_v0  ;;  %519 = vst.msk [vmem:[#allocation3] sm:$0xff] (!%p1538_p4), %vm516_vm1, %v1298_v3  ;;  %520 = vst.msk [vmem:[#allocation3 + $0x8] sm:$0xff] (!%p1538_p4), %vm516_vm1, %v1298_v3 }
  0x34   : > { %s1090_s28 = sshll.u32 %s1402_s27, 5  ;;  %s411_s11 = scalar_lea.vmem %s1525_s7, %s1402_s27  ;;  %1121 = vmatprep.mubr.msk.f32.mxu0 (!%p1538_p4), %vm434_vm0, %v424_v1  ;;  %1120 = vmatpush3.msra.mxu0 (!%p1538_p4), %v426_v0  ;;  %v1074_v4 = vld [vmem:[%s1520_s2] ss:$0 sm:$0xff] (!%p1538_p4) }
  0x35   : > { %s1412_s16 = scalar_lea.vmem %s1524_s6, %s1090_s28  ;;  %s1091_s17 = sshll.u32 %s1402_s27, 6  ;;  %1122 = vmatmul.mubr.msk.f32.vlgmr.msra.gmra.mrb[0].mxu0 (!%p1538_p4), %vm434_vm0, %v425_v2 }
  0x36   : > { %s1418_s20 = scalar_lea.vmem %s1526_s8, %s1091_s17  ;;  %s419_s23 = scalar_lea.vmem %s1527_s9, %s1402_s27 }
 0x108   : > { %v1123_v5 = vpop.f32.mrb[0].mxu0 }
 0x109   : > { %v513_v6 = vadd.f32 %v1123_v5, %v1074_v4  ;;  %v507_v7 = vpop.f32.mrb[1].mxu0 }
 0x10a   : > { %v508_v8 = vadd.f32 %v1074_v4, %v507_v7 }
 0x10b   : > { %518 = vst.msk [vmem:[#allocation2 + $0x8] sm:$0xff] %vm516_vm1, %v513_v6 }
 0x10c   : > { %517 = vst.msk [vmem:[#allocation2] sm:$0xff] %vm516_vm1, %v508_v8 }
 0x10d PF: > { %s525_s17 = sld [smem:[#allocation4 + %s1360_s14]]  ;;  %v523_v11 = vld [vmem:[%s1521_s3] sm:$0xff]  ;;  %vm552_vm2 = vcmask 130048   ;;  %vm534_vm3 = vcmask 261120   ;;  %v524_v38 = vld [vmem:[%s1521_s3 + $0x8] sm:$0xff]  ;;  %v774_v60 = vld [vmem:[%s1412_s16 + $0x10] sm:$0xff] }
 0x10e   : > { %1128 = vmatprep.mubr.msk.f32.mxu0 %vm552_vm2, %v523_v11  ;;  %v772_v57 = vld [vmem:[%s1412_s16] sm:$0xff]  ;;  %v773_v58 = vld [vmem:[%s1412_s16 + $0x8] sm:$0xff]  ;;  %v775_v61 = vld [vmem:[%s1412_s16 + $0x18] sm:$0xff]  ;;  %s526_s16 = sld [smem:[#allocation6 + %s1360_s14]]  ;;  %vm881_vm12 = vcmask 523264   ;;  %p1087_p6 = scmp.ne.s32.totalorder %s1360_s14, 1 }
 0x10f   : > { %v1176_v59 = vpack.c.bf16 %v773_v58, %v772_v57  ;;  %v1180_v62 = vpack.c.bf16 %v775_v61, %v774_v60  ;;  %v866_v63 = vld [vmem:[%s1418_s20] sm:$0xff]  ;;  %v867_v0 = vld [vmem:[%s1418_s20 + $0x8] sm:$0xff]  ;;  %v868_v1 = vld [vmem:[%s1418_s20 + $0x10] sm:$0xff] }
 0x110   : > { %v1184_v2 = vpack.c.bf16 %v867_v0, %v866_v63  ;;  %v869_v3 = vld [vmem:[%s1418_s20 + $0x18] sm:$0xff]  ;;  %v870_v5 = vld [vmem:[%s1418_s20 + $0x20] sm:$0xff]  ;;  %v871_v6 = vld [vmem:[%s1418_s20 + $0x28] sm:$0xff] }
 0x111   : > { %v1188_v4 = vpack.c.bf16 %v869_v3, %v868_v1  ;;  %v1192_v7 = vpack.c.bf16 %v871_v6, %v870_v5 }
 0x112   : > { %v1440_v10 = vld [vmem:[#allocation2 + $0x8] sm:$0xff]  ;;  %1185 = vmatprep.subr.bf16.mxu1 %v1184_v2 }
 0x113   : > { %v1438_v9 = vld [vmem:[#allocation2] sm:$0xff]  ;;  %v528_v13 = vmax.f32 %v1440_v10, 0.0  ;;  %v531_v16 = vstv %s525_s17  ;;  %v738_v41 = vmul.f32 %v1440_v10, %v1440_v10  ;;  %1187 = vmatpush3.bf16.msra.mxu1 %v1184_v2 }
 0x114   : > { %v527_v12 = vmax.f32 %v1438_v9, 0.0  ;;  %v737_v39 = vmul.f32 %v1438_v9, %v1438_v9  ;;  %1189 = vmatprep.subr.bf16.mxu1 %v1188_v4 }
 0x115   : > { %v530_v15 = vadd.f32 1e-07, %v528_v13  ;;  %v742_v42 = vsel %vm534_vm3, %v738_v41, 0.0 }
 0x116   : > { %v529_v14 = vadd.f32 1e-07, %v527_v12  ;;  %v739_v40 = vsel %vm534_vm3, %v737_v39, 0.0 }
 0x117   : > { %v533_v18 = vmul.f32 %v531_v16, %v530_v15  ;;  %740 = vadd.xlane.f32.xlu1 %v739_v40  ;;  %1191 = vmatpush3.bf16.msra.mxu1 %v1188_v4 }
 0x118   : > { %v532_v17 = vmul.f32 %v531_v16, %v529_v14  ;;  %1193 = vmatprep.subr.bf16.mxu1 %v1192_v7 }
 0x119   : > { %v536_v20 = vsel %vm534_vm3, %v533_v18, -inf }
 0x11a   : > { %v535_v19 = vsel %vm534_vm3, %v532_v17, -inf }
 0x11b   : > { %v537_v21 = vmax.f32 %v535_v19, %v536_v20  ;;  %743 = vadd.xlane.f32.xlu1 %v742_v42  ;;  %1195 = vmatpush3.bf16.msra.mxu1 %v1192_v7 }
 0x11d   : > { %v538_v22 = vrot.slane %v537_v21, 4 }
 0x11f   : > { %v539_v23 = vmax.f32 %v537_v21, %v538_v22 }
 0x121   : > { %v540_v24 = vrot.slane %v539_v23, 2 }
 0x123   : > { %v541_v25 = vmax.f32 %v539_v23, %v540_v24 }
 0x125   : > { %v542_v26 = vrot.slane %v541_v25, 1 }
 0x127   : > { %v543_v27 = vmax.f32 %v541_v25, %v542_v26 }
 0x129   : > { %v544_v28 = vsub.f32 %v532_v17, %v543_v27  ;;  %v545_v29 = vsub.f32 %v533_v18, %v543_v27 }
 0x12b   : > { %v546_v30 = vmul.f32 1.442695, %v544_v28  ;;  %v548_v31 = vmul.f32 1.442695, %v545_v29 }
 0x12d   : > { %1230 = vpow2.f32 %v546_v30 }
 0x12e   : > { %1232 = vpow2.f32 %v548_v31 }
 0x137   : > { %v1231_v32 = vpop.eup %1230 }
 0x138   : > { %v1233_v33 = vpop.eup %1232  ;;  %v550_v34 = vmul.f32 %v1231_v32, %v529_v14 }
 0x139   : > { %v551_v35 = vmul.f32 %v1233_v33, %v530_v15  ;;  %v1172_v37 = vpack.c.bf16 %v1233_v33, %v1231_v32 }
 0x13b   : > { %v1168_v36 = vpack.c.bf16 %v551_v35, %v550_v34 }
 0x13d   : > { %1169 = vmatprep.subr.bf16.mxu0 %v1168_v36 }
 0x13e   : > { %1171 = vmatpush3.bf16.msra.mxu0 %v1168_v36  ;;  %v767_v36 = vstv %s526_s16 }
 0x13f   : > { %1173 = vmatprep.subr.bf16.mxu0 %v1172_v37 }
 0x141   : > { %1129 = vmatmul.mubr.msk.f32.vlgmr.msra.gmra.mrb[0].mxu0 %vm552_vm2, %v524_v38 }
 0x142   : > { %1175 = vmatpush3.bf16.msra.mxu0 %v1172_v37  ;;  %1135 = vmatprep.mubr.msk.f32.mxu0 %vm552_vm2, %v523_v11 }
 0x143   : > { %1177 = vmatprep.subr.bf16.mxu0 %v1176_v59 }
 0x145   : > { %1136 = vmatmul.mubr.msk.f32.vlgmr.msra.gmra.mrb[2].mxu0 %vm552_vm2, %v524_v38 }
 0x146   : > { %1179 = vmatpush3.bf16.msra.mxu0 %v1176_v59  ;;  %v968_v59 = vld [vmem:[#allocation3 + $0x8] sm:$0xff] }
 0x147   : > { %1181 = vmatprep.subr.bf16.mxu0 %v1180_v62 }
 0x14a   : > { %1183 = vmatpush3.bf16.msra.mxu0 %v1180_v62  ;;  %v967_v62 = vld [vmem:[#allocation3] sm:$0xff] }
 0x1a4   : > { %v741_v12 = vpop.xlane.xlu1 %740 }
 0x1a5   : > { %vm747_vm8 = vcmp.eq.f32.partialorder %v741_v12, inf  ;;  %v750_v29 = vand.u32 2147483648, %v741_v12  ;;  %vm749_vm9 = vcmp.eq.f32.partialorder %v741_v12, 0.0 }
 0x1a8   : > { %v744_v14 = vpop.xlane.xlu1 %743 }
 0x1a9   : > { %vm754_vm10 = vcmp.eq.f32.partialorder %v744_v14, inf  ;;  %v757_v34 = vand.u32 2147483648, %v744_v14  ;;  %vm756_vm11 = vcmp.eq.f32.partialorder %v744_v14, 0.0 }
 0x214   : > { %v1130_v43 = vpop.f32.mrb[0].mxu0 }
 0x215   : > { %v625_v44 = vpop.f32.mrb[1].mxu0 }
 0x218   : > { %v1137_v45 = vpop.f32.mrb[2].mxu0 }
 0x219   : > { %v710_v46 = vmax.f32 %v1137_v45, 1e-07  ;;  %v700_v47 = vpop.f32.mrb[3].mxu0 }
 0x21a   : > { %v709_v48 = vmax.f32 %v700_v47, 1e-07  ;;  %v872_v47 = vld [vmem:[%s1418_s20 + $0x30] sm:$0xff] }
 0x21b   : > { %1234 = vrcp.f32 %v710_v46 }
 0x21c   : > { %1236 = vrcp.f32 %v709_v48  ;;  %v873_v48 = vld [vmem:[%s1418_s20 + $0x38] sm:$0xff] }
 0x225   : > { %v1235_v49 = vpop.eup %1234 }
 0x226   : > { %v1237_v50 = vpop.eup %1236  ;;  %v1463_v51 = vmul.f32 %v1235_v49, %v1130_v43  ;;  %v1196_v49 = vpack.c.bf16 %v873_v48, %v872_v47 }
 0x227   : > { %v1465_v52 = vmul.f32 %v1237_v50, %v625_v44  ;;  %v1081_v50 = vld [vmem:[%s411_s11] ss:$0 sm:$0xff] }
 0x228   : > { %v716_v55 = vmul.f32 %v1463_v51, %v1463_v51  ;;  %1197 = vmatprep.subr.bf16.mxu1 %v1196_v49 }
 0x229   : > { %v715_v53 = vmul.f32 %v1465_v52, %v1465_v52  ;;  %1199 = vmatpush3.bf16.msra.mxu1 %v1196_v49 }
 0x22a   : > { %v720_v56 = vsel %vm534_vm3, %v716_v55, 0.0  ;;  %v1084_v55 = vld [vmem:[%s419_s23] ss:$0 sm:$0xff] }
 0x22b   : > { %v717_v54 = vsel %vm534_vm3, %v715_v53, 0.0 }
 0x22c   : > { %718 = vadd.xlane.f32.xlu0 %v717_v54 }
 0x230   : > { %721 = vadd.xlane.f32.xlu0 %v720_v56 }
 0x2b9   : > { %v719_v8 = vpop.xlane.xlu0 %718 }
 0x2ba   : > { %1238 = vrsqrt.f32 %v719_v8  ;;  %vm725_vm4 = vcmp.eq.f32.partialorder %v719_v8, inf  ;;  %v728_v16 = vand.u32 2147483648, %v719_v8  ;;  %vm727_vm5 = vcmp.eq.f32.partialorder %v719_v8, 0.0 }
 0x2bd   : > { %v722_v11 = vpop.xlane.xlu0 %721 }
 0x2be   : > { %1240 = vrsqrt.f32 %v722_v11  ;;  %vm732_vm6 = vcmp.eq.f32.partialorder %v722_v11, inf  ;;  %v735_v22 = vand.u32 2147483648, %v722_v11  ;;  %vm734_vm7 = vcmp.eq.f32.partialorder %v722_v11, 0.0 }
 0x2bf   : > { %1242 = vrsqrt.f32 %v741_v12 }
 0x2c0   : > { %1244 = vrsqrt.f32 %v744_v14 }
 0x2c4   : > { %v1239_v13 = vpop.eup %1238 }
 0x2c5   : > { %v724_v15 = vmul.f32 %v1239_v13, %v719_v8 }
 0x2c7   : > { %v726_v17 = vsel %vm725_vm4, %v719_v8, %v724_v15 }
 0x2c8   : > { %v1241_v18 = vpop.eup %1240  ;;  %v729_v19 = vsel %vm727_vm5, %v728_v16, %v726_v17 }
 0x2c9   : > { %v759_v20 = vmax.f32 %v729_v19, 1e-12  ;;  %v731_v21 = vmul.f32 %v1241_v18, %v722_v11  ;;  %v1243_v25 = vpop.eup %1242 }
 0x2ca   : > { %v746_v27 = vmul.f32 %v1243_v25, %v741_v12  ;;  %v1245_v28 = vpop.eup %1244 }
 0x2cb   : > { %1246 = vrcp.f32 %v759_v20  ;;  %v733_v23 = vsel %vm732_vm6, %v722_v11, %v731_v21  ;;  %v753_v31 = vmul.f32 %v1245_v28, %v744_v14 }
 0x2cc   : > { %v736_v24 = vsel %vm734_vm7, %v735_v22, %v733_v23  ;;  %v748_v30 = vsel %vm747_vm8, %v741_v12, %v746_v27 }
 0x2cd   : > { %v760_v26 = vmax.f32 %v736_v24, 1e-12  ;;  %v751_v35 = vsel %vm749_vm9, %v750_v29, %v748_v30  ;;  %v755_v37 = vsel %vm754_vm10, %v744_v14, %v753_v31 }
 0x2ce   : > { %v758_v42 = vsel %vm756_vm11, %v757_v34, %v755_v37 }
 0x2cf   : > { %1248 = vrcp.f32 %v760_v26 }
 0x2d5   : > { %v1247_v32 = vpop.eup %1246 }
 0x2d6   : > { %v762_v33 = vmul.f32 %v1247_v32, %v1465_v52 }
 0x2d8   : > { %v765_v38 = vmul.f32 %v762_v33, %v751_v35 }
 0x2d9   : > { %v1249_v39 = vpop.eup %1248 }
 0x2da   : > { %v764_v40 = vmul.f32 %v1249_v39, %v1463_v51  ;;  %v768_v41 = vmul.f32 %v767_v36, %v765_v38 }
 0x2dc   : > { %v766_v43 = vmul.f32 %v764_v40, %v758_v42  ;;  %v770_v44 = vadd.f32 %v768_v41, %v1438_v9 }
 0x2de   : > { %v769_v45 = vmul.f32 %v767_v36, %v766_v43  ;;  %1146 = vmatprep.mubr.msk.f32.mxu0 %vm534_vm3, %v770_v44 }
 0x2e0   : > { %v771_v46 = vadd.f32 %v769_v45, %v1440_v10 }
 0x2e2   : > { %1147 = vmatmul.mubr.msk.f32.vlgmr.msra.gmra.mrb[4].mxu0 %vm534_vm3, %v771_v46 }
 0x3b5   : > { %v1148_v51 = vpop.f32.mrb[4].mxu0 }
 0x3b6   : > { %v861_v9 = vadd.f32 %v1148_v51, %v1081_v50  ;;  %v855_v52 = vpop.f32.mrb[5].mxu0 }
 0x3b7   : > { %v856_v53 = vadd.f32 %v1081_v50, %v855_v52 }
 0x3b8   : > { %v865_v10 = vmax.f32 %v861_v9, 0.0 }
 0x3b9   : > { %v864_v54 = vmax.f32 %v856_v53, 0.0 }
 0x3bb   : > { %1165 = vmatprep.mubr.msk.f32.mxu1 %vm881_vm12, %v864_v54 }
 0x3bc   : > { %1166 = vmatmul.mubr.msk.f32.vlgmr.msra.gmra.mrb[0].mxu1 %vm881_vm12, %v865_v10 }
 0x48f   : > { %v1167_v56 = vpop.f32.mrb[0].mxu1 }
 0x490   : > { %v960_v57 = vadd.f32 %v1167_v56, %v1084_v55  ;;  %v954_v58 = vpop.f32.mrb[1].mxu1 }
 0x491   : > { %v955_v60 = vadd.f32 %v1084_v55, %v954_v58  ;;  %976 = sbr.rel (%p1087_p6) target bundleno = 1184 (0x4a0), region = 76 }
 0x492   : > { %v964_v61 = vmax.f32 %v960_v57, 0.0 }
 0x493   : > { %v963_v63 = vmax.f32 %v955_v60, 0.0 }
 0x494   : > { %966 = vst.msk [vmem:[#allocation2 + $0x8] sm:$0xff] %vm534_vm3, %v964_v61  ;;  %v970_v0 = vmax.f32 %v968_v59, %v964_v61 }
 0x495   : > { %965 = vst.msk [vmem:[#allocation2] sm:$0xff] %vm534_vm3, %v963_v63  ;;  %v969_v1 = vmax.f32 %v967_v62, %v963_v63 }
 0x496   : > { %972 = vst.msk [vmem:[#allocation3 + $0x8] sm:$0xff] %vm534_vm3, %v970_v0 }
 0x497   : > { %971 = vst.msk [vmem:[#allocation3] sm:$0xff] %vm534_vm3, %v969_v1 }
 0x49d   : > { %v978_v3 = vld [vmem:[#allocation3 + $0x8] sm:$0xff] }
 0x49e   : > { %v977_v2 = vld [vmem:[#allocation3] sm:$0xff]  ;;  %980 = vst.msk [vmem:[%s1528_s10 + $0x8] sm:$0xff] %vm534_vm3, %v978_v3 }
 0x49f   : > { %979 = vst.msk [vmem:[%s1528_s10] sm:$0xff] %vm534_vm3, %v977_v2 }
 0x4a0 PF: > { %s22_s13 = sadd.s32 1, %s1294_s13  }
 0x4a1   : > { %p19_p13 = scmp.ge.s32.totalorder %s22_s13, 4  }
 0x4a3   :  { %21 = sbr.rel (!%p19_p13) target bundleno = 2 (0x2), region = 112 }
 0x4aa   :  { %992 = vsyncpa [#allocation5], 1 }
 0x4ab   :  { %994 = vsyncpa [#allocation5 + $0x1], 1 }
 0x4ac   :  { %995 = vsyncpa [#allocation7], 1 }

// kernel: extractor_forward.3
= control target key start
LH: loop header
LB: loop body
LE: loop exit
PB: predicated region body
PF: predicated region fallthrough
CT: control target
= control target key end

     0   :  { %v2362_v3 = vmov 0.0|0.0   ;;  %vm2363_vm0 = vmmov 0   ;;  %v2364_v11 = vmov 0.0   ;;  %s2790_s0 = inlined_call_operand.vmem [shape: f32[16,32], index: 0, kind: input, shape index: {}]   ;;  %s2791_s1 = inlined_call_operand.vmem [shape: f32[2,16], index: 1, kind: input, shape index: {}]   ;;  %s2792_s2 = inlined_call_operand.vmem [shape: f32[4,32,32], index: 2, kind: input, shape index: {}]   ;;  %s2793_s3 = inlined_call_operand.vmem [shape: f32[4,32,32], index: 3, kind: input, shape index: {}]   ;;  %s2794_s4 = inlined_call_operand.vmem [shape: f32[4,1,32], index: 4, kind: input, shape index: {}]   ;;  %s2795_s5 = inlined_call_operand.vmem [shape: f32[32,16], index: 5, kind: input, shape index: {}]   ;;  %s2796_s6 = inlined_call_operand.vmem [shape: f32[32,16], index: 6, kind: input, shape index: {}]   ;;  %s2797_s7 = inlined_call_operand.vmem [shape: f32[1,16], index: 7, kind: input, shape index: {}]   ;;  %s2798_s8 = inlined_call_operand.hbm [shape: f32[2,16], index: 8, kind: output, shape index: {}]  }
   0x1   :  { %v37_v0 = vld [vmem:[%s2793_s3] sm:$0xff]  ;;  %v38_v1 = vld [vmem:[%s2793_s3 + $0x8] sm:$0xff]  ;;  %2172 = vmatprep.subr.bf16.mxu0 %v2362_v3  ;;  %2178 = vmatprep.subr.bf16.mxu1 %v2362_v3  ;;  %v39_v6 = vld [vmem:[%s2793_s3 + $0x10] sm:$0xff] }
   0x2   :  { %v33_v2 = vld [vmem:[%s2792_s2] sm:$0xff]  ;;  %v2422_v4 = vpack.c.bf16 %v38_v1, %v37_v0  ;;  %v34_v5 = vld [vmem:[%s2792_s2 + $0x8] sm:$0xff]  ;;  %v40_v7 = vld [vmem:[%s2793_s3 + $0x18] sm:$0xff]  ;;  %1954 = vmatprep.mubr.msk.f32.mxu0 %vm2363_vm0, %v2364_v11  ;;  %1965 = vmatprep.mubr.msk.f32.mxu1 %vm2363_vm0, %v2364_v11 }
   0x3   :  { %v2433_v8 = vpack.c.bf16 %v34_v5, %v33_v2  ;;  %v35_v9 = vld [vmem:[%s2792_s2 + $0x10] sm:$0xff]  ;;  %v36_v10 = vld [vmem:[%s2792_s2 + $0x18] sm:$0xff]  ;;  %v2446_v12 = vpack.c.bf16 %v40_v7, %v39_v6  ;;  %v1794_v14 = vld [vmem:[%s2793_s3 + $0x20] sm:$0xff] }
   0x4   :  { %2174 = vmatpush3.bf16.msra.mxu0 %v2422_v4  ;;  %v2450_v13 = vpack.c.bf16 %v36_v10, %v35_v9  ;;  %v1795_v15 = vld [vmem:[%s2793_s3 + $0x28] sm:$0xff]  ;;  %v1790_v16 = vld [vmem:[%s2792_s2 + $0x20] sm:$0xff]  ;;  %v1796_v20 = vld [vmem:[%s2793_s3 + $0x30] sm:$0xff] }
   0x5   :  { %2180 = vmatpush3.bf16.msra.mxu1 %v2433_v8  ;;  %2175 = vmatprep.subr.bf16.mxu0 %v2362_v3  ;;  %v1791_v17 = vld [vmem:[%s2792_s2 + $0x28] sm:$0xff]  ;;  %v2466_v18 = vpack.c.bf16 %v1795_v15, %v1794_v14  ;;  %v1797_v21 = vld [vmem:[%s2793_s3 + $0x38] sm:$0xff]  ;;  %v1792_v22 = vld [vmem:[%s2792_s2 + $0x30] sm:$0xff] }
   0x6   :  { %2181 = vmatprep.subr.bf16.mxu1 %v2362_v3  ;;  %v2470_v19 = vpack.c.bf16 %v1791_v17, %v1790_v16  ;;  %v1793_v23 = vld [vmem:[%s2792_s2 + $0x38] sm:$0xff] }
   0x8   :  { %2177 = vmatpush3.bf16.msra.mxu0 %v2446_v12 }
   0x9   :  { %2183 = vmatpush3.bf16.msra.mxu1 %v2450_v13  ;;  %2184 = vmatprep.subr.bf16.mxu0 %v2362_v3 }
   0xa   :  { %2190 = vmatprep.subr.bf16.mxu1 %v2362_v3 }
   0xb   :  { %1955 = vmatmul.mubr.f32.vlgmr.msra.gmra.mrb[0].mxu0 %v2364_v11 }
   0xc   :  { %13 = vsyncpa [#allocation3], 0  ;;  %1966 = vmatmul.mubr.f32.vlgmr.msra.gmra.mrb[0].mxu1 %v2364_v11  ;;  %2186 = vmatpush3.bf16.msra.mxu0 %v2466_v18  ;;  %v2488_v24 = vpack.c.bf16 %v1797_v21, %v1796_v20  ;;  %v2492_v25 = vpack.c.bf16 %v1793_v23, %v1792_v22  ;;  %v1805_v26 = vld [vmem:[%s2793_s3 + $0x40] sm:$0xff]  ;;  %v1806_v27 = vld [vmem:[%s2793_s3 + $0x48] sm:$0xff]  ;;  %vm41_vm1 = vcmask 261120   ;;  %vm775_vm4 = vcmask 123904  }
   0xd   :  { %2192 = vmatpush3.bf16.msra.mxu1 %v2470_v19  ;;  %2187 = vmatprep.subr.bf16.mxu0 %v2362_v3  ;;  %v1801_v28 = vld [vmem:[%s2792_s2 + $0x40] sm:$0xff]  ;;  %v1802_v29 = vld [vmem:[%s2792_s2 + $0x48] sm:$0xff]  ;;  %v2512_v30 = vpack.c.bf16 %v1806_v27, %v1805_v26  ;;  %v1807_v32 = vld [vmem:[%s2793_s3 + $0x50] sm:$0xff]  ;;  %vm789_vm5 = vcmask 130048  }
   0xe   :  { %2193 = vmatprep.subr.bf16.mxu1 %v2362_v3  ;;  %1976 = vmatprep.mubr.msk.f32.mxu0 %vm2363_vm0, %v2364_v11  ;;  %v2516_v31 = vpack.c.bf16 %v1802_v29, %v1801_v28  ;;  %v1808_v33 = vld [vmem:[%s2793_s3 + $0x58] sm:$0xff]  ;;  %v1803_v34 = vld [vmem:[%s2792_s2 + $0x50] sm:$0xff]  ;;  %v1815_v38 = vld [vmem:[%s2793_s3 + $0x60] sm:$0xff] }
   0xf   :  { %1987 = vmatprep.mubr.msk.f32.mxu1 %vm2363_vm0, %v2364_v11  ;;  %v1804_v35 = vld [vmem:[%s2792_s2 + $0x58] sm:$0xff]  ;;  %v2534_v36 = vpack.c.bf16 %v1808_v33, %v1807_v32  ;;  %v1816_v39 = vld [vmem:[%s2793_s3 + $0x68] sm:$0xff]  ;;  %v1811_v40 = vld [vmem:[%s2792_s2 + $0x60] sm:$0xff] }
  0x10   :  { %2189 = vmatpush3.bf16.msra.mxu0 %v2488_v24  ;;  %v2538_v37 = vpack.c.bf16 %v1804_v35, %v1803_v34  ;;  %v1812_v41 = vld [vmem:[%s2792_s2 + $0x68] sm:$0xff]  ;;  %v2558_v42 = vpack.c.bf16 %v1816_v39, %v1815_v38  ;;  %v1817_v44 = vld [vmem:[%s2793_s3 + $0x70] sm:$0xff]  ;;  %v1818_v45 = vld [vmem:[%s2793_s3 + $0x78] sm:$0xff] }
  0x11   :  { %2195 = vmatpush3.bf16.msra.mxu1 %v2492_v25  ;;  %2196 = vmatprep.subr.bf16.mxu0 %v2362_v3  ;;  %v2562_v43 = vpack.c.bf16 %v1812_v41, %v1811_v40  ;;  %v1813_v46 = vld [vmem:[%s2792_s2 + $0x70] sm:$0xff]  ;;  %v1814_v47 = vld [vmem:[%s2792_s2 + $0x78] sm:$0xff]  ;;  %v2580_v48 = vpack.c.bf16 %v1818_v45, %v1817_v44  ;;  %v30_v50 = vld [vmem:[%s2790_s0] sm:$0xff] }
  0x12   :  { %2202 = vmatprep.subr.bf16.mxu1 %v2362_v3  ;;  %v2584_v49 = vpack.c.bf16 %v1814_v47, %v1813_v46  ;;  %v31_v51 = vld [vmem:[%s2790_s0 + $0x8] sm:$0xff]  ;;  %vm2611_vm2 = vmpackc.low %vm41_vm1, %vm41_vm1  ;;  %v2624_v56 = vld [vmem:[%s2794_s4] ss:$0 sm:$0xff] }
  0x13   :  { %1977 = vmatmul.mubr.f32.vlgmr.msra.gmra.mrb[2].mxu0 %v2364_v11  ;;  %v2607_v52 = vpack.c.bf16 %v31_v51, %v30_v50  ;;  %v2630_v0 = vld [vmem:[%s2794_s4 + $0x1] ss:$0 sm:$0xff]  ;;  %v2636_v14 = vld [vmem:[%s2794_s4 + $0x2] ss:$0 sm:$0xff]  ;;  %v2642_v27 = vld [vmem:[%s2794_s4 + $0x3] ss:$0 sm:$0xff] }
  0x14   :  { %1988 = vmatmul.mubr.f32.vlgmr.msra.gmra.mrb[2].mxu1 %v2364_v11  ;;  %2198 = vmatpush3.bf16.msra.mxu0 %v2512_v30 }
  0x15   :  { %2204 = vmatpush3.bf16.msra.mxu1 %v2516_v31  ;;  %2199 = vmatprep.subr.bf16.mxu0 %v2362_v3 }
  0x16   :  { %2205 = vmatprep.subr.bf16.mxu1 %v2362_v3  ;;  %1998 = vmatprep.mubr.msk.f32.mxu0 %vm2363_vm0, %v2364_v11 }
  0x17   :  { %2009 = vmatprep.mubr.msk.f32.mxu1 %vm2363_vm0, %v2364_v11 }
  0x18   :  { %2201 = vmatpush3.bf16.msra.mxu0 %v2534_v36 }
  0x19   :  { %2207 = vmatpush3.bf16.msra.mxu1 %v2538_v37  ;;  %2208 = vmatprep.subr.bf16.mxu0 %v2362_v3 }
  0x1a   :  { %2214 = vmatprep.subr.bf16.mxu1 %v2362_v3 }
  0x1b   :  { %1999 = vmatmul.mubr.f32.vlgmr.msra.gmra.mrb[4].mxu0 %v2364_v11 }
  0x1c   :  { %2010 = vmatmul.mubr.f32.vlgmr.msra.gmra.mrb[4].mxu1 %v2364_v11  ;;  %2210 = vmatpush3.bf16.msra.mxu0 %v2558_v42 }
  0x1d   :  { %2216 = vmatpush3.bf16.msra.mxu1 %v2562_v43  ;;  %2211 = vmatprep.subr.bf16.mxu0 %v2362_v3 }
  0x1e   :  { %2217 = vmatprep.subr.bf16.mxu1 %v2362_v3  ;;  %2020 = vmatprep.mubr.msk.f32.mxu0 %vm2363_vm0, %v2364_v11 }
  0x1f   :  { %2031 = vmatprep.mubr.msk.f32.mxu1 %vm2363_vm0, %v2364_v11 }
  0x20   :  { %2213 = vmatpush3.bf16.msra.mxu0 %v2580_v48 }
  0x21   :  { %2219 = vmatpush3.bf16.msra.mxu1 %v2584_v49  ;;  %2220 = vmatprep.subr.bf16.mxu0 %v2362_v3 }
  0x22   :  { %2224 = vmatprep.subr.bf16.mxu1 %v2362_v3 }
  0x23   :  { %2021 = vmatmul.mubr.f32.vlgmr.msra.gmra.mrb[6].mxu0 %v2364_v11 }
  0x24   :  { %2032 = vmatmul.mubr.f32.vlgmr.msra.gmra.mrb[6].mxu1 %v2364_v11  ;;  %2038 = vmatprep.mubr.msk.f32.mxu0 %vm2363_vm0, %v2364_v11 }
  0x25   :  { %2045 = vmatprep.mubr.msk.f32.mxu1 %vm2363_vm0, %v2364_v11  ;;  %2226 = vmatpush3.bf16.msra.mxu1 %v2607_v52 }
  0x26   :  { %2227 = vmatprep.subr.bf16.mxu1 %v2362_v3 }
  0x29   :  { %2223 = vmatpush3.bf16.xpose.msk.msra.mxu0 %vm2611_vm2, %v2607_v52 }
  0x2a   :  { %2233 = vmatprep.subr.bf16.mxu0 %v2362_v3 }
  0xde   :  { %v111_v54 = vpop.f32.mrb[0].mxu0 }
  0xdf   :  { %v181_v55 = vpop.f32.mrb[0].mxu1  ;;  %v1956_v57 = vpop.f32.mrb[1].mxu0 }
  0xe0   :  { %v182_v58 = vadd.f32 %v181_v55, %v111_v54  ;;  %v1967_v59 = vpop.f32.mrb[1].mxu1 }
  0xe2   :  { %v192_v60 = vadd.f32 %v2624_v56, %v182_v58 }
  0xe4   :  { %v1789_v61 = vmul.f32 -1.442695, %v192_v60 }
  0xe6   :  { %2298 = vpow2.f32 %v1789_v61  ;;  %v275_v62 = vpop.f32.mrb[2].mxu0 }
  0xe7   :  { %v345_v63 = vpop.f32.mrb[2].mxu1  ;;  %v1978_v1 = vpop.f32.mrb[3].mxu0 }
  0xe8   :  { %v346_v2 = vadd.f32 %v345_v63, %v275_v62  ;;  %v1989_v5 = vpop.f32.mrb[3].mxu1 }
  0xea   :  { %v357_v6 = vadd.f32 %v2630_v0, %v346_v2 }
  0xec   :  { %v1800_v7 = vmul.f32 -1.442695, %v357_v6 }
  0xee   :  { %2300 = vpow2.f32 %v1800_v7  ;;  %v440_v9 = vpop.f32.mrb[4].mxu0 }
  0xef   :  { %v510_v10 = vpop.f32.mrb[4].mxu1  ;;  %v2000_v15 = vpop.f32.mrb[5].mxu0 }
  0xf0   :  { %v2299_v16 = vpop.eup %2298  ;;  %v511_v17 = vadd.f32 %v510_v10, %v440_v9  ;;  %v2011_v20 = vpop.f32.mrb[5].mxu1 }
  0xf1   :  { %v196_v21 = vadd.f32 1.0, %v2299_v16 }
  0xf2   :  { %v522_v22 = vadd.f32 %v2636_v14, %v511_v17 }
  0xf3   :  { %2302 = vrcp.f32 %v196_v21 }
  0xf4   :  { %2304 = vtanh.f32 %v522_v22 }
  0xf6   :  { %v600_v23 = vpop.f32.mrb[6].mxu0 }
  0xf7   :  { %v670_v26 = vpop.f32.mrb[6].mxu1  ;;  %v2022_v28 = vpop.f32.mrb[7].mxu0 }
  0xf8   :  { %v2301_v29 = vpop.eup %2300  ;;  %v671_v32 = vadd.f32 %v670_v26, %v600_v23  ;;  %v2033_v33 = vpop.f32.mrb[7].mxu1 }
  0xf9   :  { %v361_v34 = vadd.f32 1.0, %v2301_v29 }
  0xfa   :  { %v682_v35 = vadd.f32 %v2642_v27, %v671_v32 }
  0xfb   :  { %2306 = vrcp.f32 %v361_v34 }
  0xfc   :  { %v1821_v38 = vmul.f32 -1.442695, %v682_v35 }
  0xfd   :  { %v2303_v39 = vpop.eup %2302 }
  0xfe   :  { %v2305_v40 = vpop.eup %2304  ;;  %2308 = vpow2.f32 %v1821_v38 }
  0xff   :  { %v690_v41 = vmul.f32 %v2305_v40, %v2303_v39 }
 0x105   :  { %v2307_v44 = vpop.eup %2306 }
 0x106   :  { %v689_v45 = vmul.f32 0.0, %v2307_v44 }
 0x108   :  { %v2309_v46 = vpop.eup %2308  ;;  %v2645_v47 = vadd.f32 %v690_v41, %v689_v45 }
 0x109   :  { %v686_v50 = vadd.f32 1.0, %v2309_v46 }
 0x10a   :  { %2310 = vtanh.f32 %v2645_v47 }
 0x10b   :  { %2312 = vrcp.f32 %v686_v50  ;;  %v1614_v50 = vld [vmem:[%s2795_s5] sm:$0xff] }
 0x114   :  { %v2311_v51 = vpop.eup %2310 }
 0x115   :  { %v2313_v54 = vpop.eup %2312 }
 0x116   :  { %v693_v55 = vmul.f32 %v2313_v54, %v2311_v51 }
 0x118   :  { %2039 = vmatmul.mubr.msk.f32.vlgmr.msra.gmra.mrb[8].mxu0 %vm41_vm1, %v693_v55 }
 0x119   :  { %2235 = vmatpush3.bf16.msra.mxu0 %v2433_v8  ;;  %2067 = vmatprep.mubr.msk.f32.mxu0 %vm2363_vm0, %v2364_v11  ;;  %v2684_v8 = vld [vmem:[%s2791_s1] sm:$0x3] }
 0x11a   :  { %2236 = vmatprep.subr.bf16.mxu0 %v2362_v3  ;;  %vm773_vm3 = vcmp.gt.f32.partialorder %v2684_v8, 0.0 }
 0x11d   :  { %2238 = vmatpush3.bf16.msra.mxu0 %v2450_v13 }
 0x11e   :  { %2245 = vmatprep.subr.bf16.mxu0 %v2362_v3 }
 0x120   :  { %2068 = vmatmul.mubr.msk.f32.vlgmr.msra.gmra.mrb[10].mxu0 %vm41_vm1, %v693_v55 }
 0x121   :  { %2247 = vmatpush3.bf16.msra.mxu0 %v2470_v19  ;;  %2089 = vmatprep.mubr.msk.f32.mxu0 %vm2363_vm0, %v2364_v11 }
 0x122   :  { %2248 = vmatprep.subr.bf16.mxu0 %v2362_v3 }
 0x125   :  { %2250 = vmatpush3.bf16.msra.mxu0 %v2492_v25 }
 0x126   :  { %2257 = vmatprep.subr.bf16.mxu0 %v2362_v3 }
 0x128   :  { %2090 = vmatmul.mubr.msk.f32.vlgmr.msra.gmra.mrb[12].mxu0 %vm41_vm1, %v693_v55 }
 0x129   :  { %2259 = vmatpush3.bf16.msra.mxu0 %v2516_v31  ;;  %2111 = vmatprep.mubr.msk.f32.mxu0 %vm2363_vm0, %v2364_v11 }
 0x12a   :  { %2260 = vmatprep.subr.bf16.mxu0 %v2362_v3 }
 0x12d   :  { %2262 = vmatpush3.bf16.msra.mxu0 %v2538_v37 }
 0x12e   :  { %2269 = vmatprep.subr.bf16.mxu0 %v2362_v3 }
 0x130   :  { %2112 = vmatmul.mubr.msk.f32.vlgmr.msra.gmra.mrb[14].mxu0 %vm41_vm1, %v693_v55 }
 0x131   :  { %2271 = vmatpush3.bf16.msra.mxu0 %v2562_v43  ;;  %2133 = vmatprep.mubr.msk.f32.mxu0 %vm2363_vm0, %v2364_v11 }
 0x132   :  { %2272 = vmatprep.subr.bf16.mxu0 %v2362_v3 }
 0x135   :  { %2274 = vmatpush3.bf16.msra.mxu0 %v2584_v49 }
 0x136   :  { %2279 = vmatprep.subr.bf16.mxu0 %v2362_v3 }
 0x138   :  { %2134 = vmatmul.mubr.msk.f32.vlgmr.msra.gmra.mrb[16].mxu0 %vm41_vm1, %v693_v55 }
 0x139   :  { %2281 = vmatpush3.bf16.msra.mxu0 %v2607_v52  ;;  %2147 = vmatprep.mubr.msk.f32.mxu0 %vm2363_vm0, %v2364_v11 }
 0x13a   :  { %2282 = vmatprep.subr.bf16.mxu0 %v2362_v3 }
 0x1eb   :  { %v769_v13 = vpop.f32.mrb[8].mxu0 }
 0x1ec   :  { %v774_v19 = vsel %vm773_vm3, %v769_v13, -1e+30  ;;  %v2040_v25 = vpop.f32.mrb[9].mxu0 }
 0x1ed   :  { %v776_v31 = vsel %vm775_vm4, %v774_v19, -inf }
 0x1ee   :  { %777 = vmax.xlane.f32.xlu0 %v776_v31 }
 0x1f3   :  { %v1002_v37 = vpop.f32.mrb[10].mxu0 }
 0x1f4   :  { %v2069_v43 = vpop.f32.mrb[11].mxu0 }
 0x1fb   :  { %v1149_v49 = vpop.f32.mrb[12].mxu0 }
 0x1fc   :  { %v2091_v57 = vpop.f32.mrb[13].mxu0 }
 0x203   :  { %v1296_v58 = vpop.f32.mrb[14].mxu0 }
 0x204   :  { %v2113_v59 = vpop.f32.mrb[15].mxu0 }
 0x20b   :  { %v2690_v60 = vpop.f32.mrb[16].mxu0 }
 0x20c   :  { %v2135_v61 = vpop.f32.mrb[17].mxu0 }
 0x27b   :  { %v778_v62 = vpop.xlane.xlu0 %777 }
 0x27c   :  { %v779_v63 = vsub.f32 %v774_v19, %v778_v62  ;;  %v1617_v19 = vld [vmem:[%s2795_s5 + $0x18] sm:$0xff] }
 0x27e   :  { %v780_v1 = vmul.f32 1.442695, %v779_v63 }
 0x280   :  { %2314 = vpow2.f32 %v780_v1 }
 0x28a   :  { %v2315_v2 = vpop.eup %2314 }
 0x28b   :  { %v782_v5 = vmul.f32 %v2315_v2, %v2684_v8 }
 0x28d   :  { %v783_v6 = vsel %vm775_vm4, %v782_v5, 0.0 }
 0x28e   :  { %784 = vadd.xlane.f32.xlu0 %v783_v6  ;;  %v1618_v6 = vld [vmem:[%s2796_s6] sm:$0xff] }
 0x31b   :  { %v785_v7 = vpop.xlane.xlu0 %784 }
 0x31c   :  { %v786_v9 = vmax.f32 %v785_v7, 1e-12  ;;  %v1619_v7 = vld [vmem:[%s2796_s6 + $0x8] sm:$0xff] }
 0x31e   :  { %2316 = vrcp.f32 %v786_v9 }
 0x328   :  { %v2317_v10 = vpop.eup %2316 }
 0x329   :  { %v788_v15 = vmul.f32 %v2317_v10, %v782_v5  ;;  %v2283_v10 = vpack.c.bf16 %v1619_v7, %v1618_v6 }
 0x32b   :  { %2046 = vmatmul.mubr.msk.f32.vlgmr.msra.gmra.mrb[8].mxu1 %vm789_vm5, %v788_v15 }
 0x32c   :  { %2229 = vmatpush3.bf16.msra.mxu1 %v2422_v4  ;;  %2056 = vmatprep.mubr.msk.f32.mxu1 %vm2363_vm0, %v2364_v11 }
 0x32d   :  { %2230 = vmatprep.subr.bf16.mxu1 %v2362_v3 }
 0x330   :  { %2232 = vmatpush3.bf16.msra.mxu1 %v2446_v12 }
 0x331   :  { %2239 = vmatprep.subr.bf16.mxu1 %v2362_v3 }
 0x3fe   :  { %v859_v16 = vpop.f32.mrb[8].mxu1 }
 0x3ff   :  { %v2047_v17 = vpop.f32.mrb[9].mxu1  ;;  %2057 = vmatmul.mubr.msk.f32.vlgmr.msra.gmra.mrb[10].mxu1 %vm41_vm1, %v859_v16 }
 0x400   :  { %2241 = vmatpush3.bf16.msra.mxu1 %v2466_v18  ;;  %2078 = vmatprep.mubr.msk.f32.mxu1 %vm2363_vm0, %v2364_v11 }
 0x401   :  { %2242 = vmatprep.subr.bf16.mxu1 %v2362_v3 }
 0x404   :  { %2244 = vmatpush3.bf16.msra.mxu1 %v2488_v24 }
 0x405   :  { %2251 = vmatprep.subr.bf16.mxu1 %v2362_v3 }
 0x407   :  { %2079 = vmatmul.mubr.msk.f32.vlgmr.msra.gmra.mrb[12].mxu1 %vm41_vm1, %v859_v16 }
 0x408   :  { %2253 = vmatpush3.bf16.msra.mxu1 %v2512_v30  ;;  %2100 = vmatprep.mubr.msk.f32.mxu1 %vm2363_vm0, %v2364_v11 }
 0x409   :  { %2254 = vmatprep.subr.bf16.mxu1 %v2362_v3 }
 0x40c   :  { %2256 = vmatpush3.bf16.msra.mxu1 %v2534_v36 }
 0x40d   :  { %2263 = vmatprep.subr.bf16.mxu1 %v2362_v3 }
 0x40f   :  { %2101 = vmatmul.mubr.msk.f32.vlgmr.msra.gmra.mrb[14].mxu1 %vm41_vm1, %v859_v16 }
 0x410   :  { %2265 = vmatpush3.bf16.msra.mxu1 %v2558_v42  ;;  %2122 = vmatprep.mubr.msk.f32.mxu1 %vm2363_vm0, %v2364_v11 }
 0x411   :  { %2266 = vmatprep.subr.bf16.mxu1 %v2362_v3 }
 0x414   :  { %2268 = vmatpush3.bf16.msra.mxu1 %v2580_v48 }
 0x415   :  { %2275 = vmatprep.subr.bf16.mxu1 %v2362_v3 }
 0x417   :  { %2123 = vmatmul.mubr.msk.f32.vlgmr.msra.gmra.mrb[16].mxu1 %vm41_vm1, %v859_v16  ;;  %v1621_v16 = vld [vmem:[%s2796_s6 + $0x18] sm:$0xff] }
 0x418   :  { %2140 = vmatprep.mubr.msk.f32.mxu1 %vm2363_vm0, %v2364_v11 }
 0x41d   :  { %2278 = vmatpush3.bf16.xpose.msk.msra.mxu1 %vm2611_vm2, %v2607_v52 }
 0x41e   :  { %2288 = vmatprep.subr.bf16.mxu1 %v2362_v3 }
 0x4d2   :  { %v932_v4 = vpop.f32.mrb[10].mxu1 }
 0x4d3   :  { %v1003_v12 = vadd.f32 %v1002_v37, %v932_v4  ;;  %v2058_v18 = vpop.f32.mrb[11].mxu1 }
 0x4d5   :  { %v1006_v24 = vadd.f32 %v2624_v56, %v1003_v12 }
 0x4d7   :  { %v1828_v30 = vmul.f32 -1.442695, %v1006_v24  ;;  %v1843_v24 = vld [vmem:[%s2797_s7] ss:$0 sm:$0xff] }
 0x4d9   :  { %2318 = vpow2.f32 %v1828_v30 }
 0x4da   :  { %v1079_v36 = vpop.f32.mrb[12].mxu1 }
 0x4db   :  { %v1150_v42 = vadd.f32 %v1149_v49, %v1079_v36  ;;  %v2080_v48 = vpop.f32.mrb[13].mxu1 }
 0x4dd   :  { %v1153_v20 = vadd.f32 %v2630_v0, %v1150_v42 }
 0x4df   :  { %v1831_v21 = vmul.f32 -1.442695, %v1153_v20 }
 0x4e1   :  { %2320 = vpow2.f32 %v1831_v21 }
 0x4e2   :  { %v1226_v22 = vpop.f32.mrb[14].mxu1 }
 0x4e3   :  { %v2319_v23 = vpop.eup %2318  ;;  %v1297_v53 = vadd.f32 %v1296_v58, %v1226_v22  ;;  %v2102_v52 = vpop.f32.mrb[15].mxu1 }
 0x4e4   :  { %v1010_v26 = vadd.f32 1.0, %v2319_v23 }
 0x4e5   :  { %v1300_v28 = vadd.f32 %v2636_v14, %v1297_v53 }
 0x4e6   :  { %2322 = vrcp.f32 %v1010_v26 }
 0x4e7   :  { %2324 = vtanh.f32 %v1300_v28 }
 0x4ea   :  { %v1368_v29 = vpop.f32.mrb[16].mxu1 }
 0x4eb   :  { %v2321_v56 = vpop.eup %2320  ;;  %v1439_v32 = vadd.f32 %v2690_v60, %v1368_v29  ;;  %v2124_v33 = vpop.f32.mrb[17].mxu1 }
 0x4ec   :  { %v1157_v34 = vadd.f32 1.0, %v2321_v56 }
 0x4ed   :  { %v1442_v35 = vadd.f32 %v2642_v27, %v1439_v32  ;;  %v1615_v27 = vld [vmem:[%s2795_s5 + $0x8] sm:$0xff] }
 0x4ee   :  { %2326 = vrcp.f32 %v1157_v34  ;;  %v2289_v55 = vpack.c.bf16 %v1615_v27, %v1614_v50 }
 0x4ef   :  { %v1836_v0 = vmul.f32 -1.442695, %v1442_v35 }
 0x4f0   :  { %v2323_v38 = vpop.eup %2322 }
 0x4f1   :  { %v2325_v39 = vpop.eup %2324  ;;  %2328 = vpow2.f32 %v1836_v0 }
 0x4f2   :  { %v1450_v40 = vmul.f32 %v2325_v39, %v2323_v38 }
 0x4f8   :  { %v2327_v41 = vpop.eup %2326 }
 0x4f9   :  { %v1449_v44 = vmul.f32 %v2327_v41, %v2645_v47  ;;  %v1616_v47 = vld [vmem:[%s2795_s5 + $0x10] sm:$0xff] }
 0x4fa   :  { %v2292_v25 = vpack.c.bf16 %v1617_v19, %v1616_v47 }
 0x4fb   :  { %v2329_v14 = vpop.eup %2328  ;;  %v1451_v45 = vadd.f32 %v1450_v40, %v1449_v44 }
 0x4fc   :  { %v1446_v46 = vadd.f32 1.0, %v2329_v14 }
 0x4fd   :  { %2330 = vtanh.f32 %v1451_v45 }
 0x4fe   :  { %2332 = vrcp.f32 %v1446_v46 }
 0x507   :  { %v2331_v51 = vpop.eup %2330 }
 0x508   :  { %v2333_v54 = vpop.eup %2332 }
 0x509   :  { %v1453_v13 = vmul.f32 %v2333_v54, %v2331_v51 }
 0x50b   :  { %2141 = vmatmul.mubr.msk.f32.vlgmr.msra.gmra.mrb[18].mxu1 %vm41_vm1, %v1453_v13 }
 0x50c   :  { %2290 = vmatpush3.bf16.msra.mxu1 %v2289_v55  ;;  %2169 = vmatprep.mubr.msk.f32.mxu1 %vm2363_vm0, %v2364_v11 }
 0x50d   :  { %2291 = vmatprep.subr.bf16.mxu1 %v2362_v3 }
 0x510   :  { %2293 = vmatpush3.bf16.msra.mxu1 %v2292_v25 }
 0x513   :  { %2170 = vmatmul.mubr.msk.f32.vlgmr.msra.gmra.mrb[20].mxu1 %vm41_vm1, %v1453_v13 }
 0x5de   :  { %v1523_v31 = vpop.f32.mrb[18].mxu1 }
 0x5df   :  { %v1527_v37 = vsel %vm773_vm3, %v1523_v31, -1e+30  ;;  %v2142_v43 = vpop.f32.mrb[19].mxu1 }
 0x5e0   :  { %v1528_v49 = vsel %vm775_vm4, %v1527_v37, -inf }
 0x5e1   :  { %1529 = vmax.xlane.f32.xlu1 %v1528_v49 }
 0x5e6   :  { %v1761_v57 = vpop.f32.mrb[20].mxu1 }
 0x5e7   :  { %v2171_v58 = vpop.f32.mrb[21].mxu1 }
 0x66e   :  { %v1530_v59 = vpop.xlane.xlu1 %1529 }
 0x66f   :  { %v1531_v60 = vsub.f32 %v1527_v37, %v1530_v59 }
 0x671   :  { %v1532_v61 = vmul.f32 1.442695, %v1531_v60 }
 0x673   :  { %2334 = vpow2.f32 %v1532_v61 }
 0x67d   :  { %v2335_v62 = vpop.eup %2334 }
 0x67e   :  { %v1534_v63 = vmul.f32 %v2335_v62, %v2684_v8  ;;  %v1620_v8 = vld [vmem:[%s2796_s6 + $0x10] sm:$0xff]  ;;  %s2365_s6 = smov [#allocation2]  }
 0x67f   :  { %v2286_v17 = vpack.c.bf16 %v1621_v16, %v1620_v8  ;;  %s1780_s0 = sshll.u32 %s2365_s6, 4  ;;  %s1781_s0 = int_to_ptr.vmem [resolvable:$true] %s1780_s0 }
 0x680   :  { %v1535_v1 = vsel %vm775_vm4, %v1534_v63, 0.0  ;;  %s2338_s27 = scalar_lea.vmem %s1781_s0, 32  ;;  %p2343_p1 = scmp.lt.s32.totalorder %s1781_s0, %s1781_s0 }
 0x681   :  { %1536 = vadd.xlane.f32.xlu1 %v1535_v1  ;;  %p2339_p0 = scmp.ne.s32.totalorder %s1781_s0, %s2338_s27  ;;  %p2344_p2 = scmp.lt.s32.totalorder %s2338_s27, %s2338_s27 }
 0x683   :  { %p2345_p3 = por %p2344_p2, %p2343_p1 }
 0x685   :  { %p2346_p4 = pnand %p2345_p3, %p2339_p0 }
 0x70e   :  { %v1537_v2 = vpop.xlane.xlu1 %1536 }
 0x70f   :  { %v1538_v5 = vmax.f32 %v1537_v2, 1e-12 }
 0x711   :  { %2336 = vrcp.f32 %v1538_v5 }
 0x71b   :  { %v2337_v9 = vpop.eup %2336 }
 0x71c   :  { %v1540_v15 = vmul.f32 %v2337_v9, %v1534_v63 }
 0x71e   :  { %2148 = vmatmul.mubr.msk.f32.vlgmr.msra.gmra.mrb[18].mxu0 %vm789_vm5, %v1540_v15 }
 0x71f   :  { %2284 = vmatpush3.bf16.msra.mxu0 %v2283_v10  ;;  %2158 = vmatprep.mubr.msk.f32.mxu0 %vm2363_vm0, %v2364_v11 }
 0x720   :  { %2285 = vmatprep.subr.bf16.mxu0 %v2362_v3 }
 0x723   :  { %2287 = vmatpush3.bf16.msra.mxu0 %v2286_v17 }
 0x7f1   :  { %v1610_v4 = vpop.f32.mrb[18].mxu0 }
 0x7f2   :  { %v2149_v12 = vpop.f32.mrb[19].mxu0  ;;  %2159 = vmatmul.mubr.msk.f32.vlgmr.msra.gmra.mrb[20].mxu0 %vm41_vm1, %v1610_v4 }
 0x8c5   :  { %v1691_v18 = vpop.f32.mrb[20].mxu0 }
 0x8c6   :  { %v1762_v30 = vadd.f32 %v1761_v57, %v1691_v18  ;;  %v2160_v36 = vpop.f32.mrb[21].mxu0 }
 0x8c8   :  { %v1772_v42 = vadd.f32 %v1843_v24, %v1762_v30 }
 0x8ca   :  { %1773 = vst.msk [vmem:[#allocation2] sm:$0x3] %vm775_vm4, %v1772_v42 }
 0x8cb   :  { %2349 = shalt.err (!%p2346_p4)
}
 0x8cc   :  { %s2350_s30 = scalar_lea.hbm %s2798_s8, 32 }
 0x8cd   :  { %p2351_p5 = scmp.ne.s32.totalorder %s2798_s8, %s2350_s30  ;;  %p2354_p6 = scmp.lt.u32.totalorder %s2350_s30, %s2798_s8 }
 0x8cf   :  { %p2356_p7 = pnand %p2354_p6, %p2351_p5 }
 0x8d1   :  { %2359 = shalt.err (!%p2356_p7)
}
 0x8d2   :  { %1783 = dma.vmem_to_hbm [thread:$0]  %s1781_s0, 32, %s2798_s8, [#allocation3]  }
 0x8d3   :  { %2360 = dma.done.wait [#allocation3], 32  }
 0x8d4   :  { %2361 = vsyncadd [#allocation3], 4294967264 }
 0x8d5   :  { %1787 = vsyncpa [#allocation3], 1 }

</bundles_post_ra>
